<compile_context>
chip_gen: v6e
topology: v6e:2x2x1
jax: 0.10.0
libtpu: 0.0.40
codegen_flags: <defaults>
</compile_context>

<pallas_src>
import jax
import jax.numpy as jnp
from jax import lax
from jax.experimental import pallas as pl
from jax.experimental.pallas import tpu as pltpu

LANE = 128   # channel / K padding (TPU lane width)
GRID = 8     # padded spatial grid for the layer-1 pooled output: row = b*64 + i*8 + j


def _fused_net_kernel(pq1_ref, w1_ref, b1_ref, coords2_ref, w2_ref, b2_ref,
                      o_ref, ys_ref, m2_ref):
    """Whole Net.forward for the full batch in one kernel invocation.

    pq1_ref    : (4*M, 128)  layer-1 im2col patches, pool-offset major; M = B*64 rows,
                             row r = b*64 + i*8 + j over the (padded) 7x7 pooled grid.
    w1_ref     : (128, 128)  layer-1 weights (9*Cin1 zero-padded, Cout zero-padded).
    b1_ref     : (1, 128)    layer-1 bias (zero-padded).
    coords2_ref: (M, 128)    layer-2 coord channels (y, x, r) at lanes 100..102, else 0.
    w2_ref     : (1152, 128) layer-2 weights: 9 taps of (128, 128) stacked along K.
    b2_ref     : (1, 128)    layer-2 bias (zero-padded).
    o_ref      : (M, 128)    output; valid pooled outputs at rows b*64 + 2*pi*8 + 2*pj.
    ys_ref     : (M + 24, 128) VMEM scratch holding the layer-2 input (features+coords).
    m2_ref     : (M + 16, 128) VMEM scratch holding the layer-2 conv result.
    """
    M = o_ref.shape[0]

    # ---- layer 1: one MXU matmul over all 4 pool offsets and the whole batch --------
    m1 = jnp.dot(pq1_ref[...], w1_ref[...], preferred_element_type=jnp.float32)  # (4M,128)
    y1 = jnp.maximum(jnp.maximum(m1[0 * M:1 * M], m1[1 * M:2 * M]),
                     jnp.maximum(m1[2 * M:3 * M], m1[3 * M:4 * M]))
    y1 = jnp.maximum(y1 + b1_ref[...], 0.0)          # == maxpool2(relu(conv1)), (M, 128)

    # ---- layer 2 input: add coord channels, park in VMEM scratch (zero-padded tail) --
    ys_ref[0:M, :] = y1 + coords2_ref[...]
    ys_ref[M:M + 3 * GRID, :] = jnp.zeros((3 * GRID, LANE), jnp.float32)

    # ---- layer 2 conv: im2col == 9 row-shifted views, lane-concat, one MXU matmul ----
    x2 = jnp.concatenate(
        [ys_ref[dy * GRID + dx: dy * GRID + dx + M, :]
         for dy in range(3) for dx in range(3)],
        axis=1)                                                        # (M, 9*128)
    m2_ref[0:M, :] = jnp.dot(x2, w2_ref[...], preferred_element_type=jnp.float32)
    m2_ref[M:M + 2 * GRID, :] = jnp.zeros((2 * GRID, LANE), jnp.float32)

    # ---- 2x2 max pool over rows {r, r+1, r+8, r+9}, then bias + ReLU -----------------
    pooled = jnp.maximum(
        jnp.maximum(m2_ref[0:M, :], m2_ref[1:1 + M, :]),
        jnp.maximum(m2_ref[GRID:GRID + M, :], m2_ref[GRID + 1:GRID + 1 + M, :]))
    o_ref[...] = jnp.maximum(pooled + b2_ref[...], 0.0)


def _coord_channels(h, w):
    """AddCoordinates channels [y, x, r] for an (h, w) feature map (glue, runs in XLA)."""
    y = 2.0 * jnp.arange(h, dtype=jnp.float32)[:, None] / (h - 1.0) - 1.0
    x = 2.0 * jnp.arange(w, dtype=jnp.float32)[None, :] / (w - 1.0) - 1.0
    y = jnp.broadcast_to(y, (h, w))
    x = jnp.broadcast_to(x, (h, w))
    r = jnp.sqrt(y * y + x * x)
    r = r / jnp.max(r)
    return jnp.stack([y, x, r], axis=-1)                               # (h, w, 3)


def net_forward(x_nchw, params):
    """NCHW in/out (PyTorch convention). Whole forward is a single Pallas kernel."""
    B, _, H, W = x_nchw.shape
    x = jnp.transpose(x_nchw, (0, 2, 3, 1)).astype(jnp.float32)        # NHWC

    # ------------- layer-1 glue: coords + im2col + pool-offset/row layout -------------
    coords1 = jnp.broadcast_to(_coord_channels(H, W)[None], (B, H, W, 3))
    xin = jnp.concatenate([coords1, x], axis=-1)                       # [y, x, r, img...]
    Cin1 = xin.shape[-1]
    K1 = 9 * Cin1
    Ho, Wo = H - 2, W - 2                                              # valid 3x3 conv
    Hp, Wp = Ho // 2, Wo // 2                                          # floor max-pool
    assert 4 <= Hp <= GRID and 4 <= Wp <= GRID, "fused kernel assumes ~16x16 inputs"
    assert K1 <= LANE

    cols = [xin[:, dy:dy + Ho, dx:dx + Wo, :] for dy in range(3) for dx in range(3)]
    patches = jnp.concatenate(cols, axis=-1)                           # (B, Ho, Wo, K1)
    quads = []
    for ai in range(2):
        for bi in range(2):
            q = patches[:, ai:ai + 2 * Hp:2, bi:bi + 2 * Wp:2, :]      # (B, Hp, Wp, K1)
            q = jnp.pad(q, ((0, 0), (0, GRID - Hp), (0, GRID - Wp), (0, LANE - K1)))
            quads.append(q.reshape(B * GRID * GRID, LANE))
    pq1 = jnp.concatenate(quads, axis=0)                               # (4*M, 128)

    w1 = params["w1"].astype(jnp.float32)                              # (Cout1, Cin1, 3, 3)
    b1 = params["b1"].astype(jnp.float32)
    Cout1 = w1.shape[0]
    w1p = jnp.pad(jnp.transpose(w1, (2, 3, 1, 0)).reshape(K1, Cout1),
                  ((0, LANE - K1), (0, LANE - Cout1)))                 # (128, 128)
    b1p = jnp.pad(b1, (0, LANE - Cout1)).reshape(1, LANE)

    # ------------- layer-2 glue: coord constants + tap-stacked weights ----------------
    w2 = params["w2"].astype(jnp.float32)                              # (Cout2, Cout1+3, 3, 3)
    b2 = params["b2"].astype(jnp.float32)
    Cout2, Cin2 = w2.shape[0], w2.shape[1]
    assert Cin2 == Cout1 + 3 and Cin2 <= LANE and Cout2 <= LANE
    # kernel channel layout is [feat0..Cout1-1, y, x, r]; torch order is [y, x, r, feat..]
    w2r = jnp.concatenate([w2[:, 3:, :, :], w2[:, :3, :, :]], axis=1)  # (Cout2, Cin2, 3, 3)
    taps = []
    for dy in range(3):
        for dx in range(3):
            t = jnp.transpose(w2r[:, :, dy, dx], (1, 0))               # (Cin2, Cout2)
            taps.append(jnp.pad(t, ((0, LANE - Cin2), (0, LANE - Cout2))))
    w2cat = jnp.concatenate(taps, axis=0)                              # (1152, 128)
    b2p = jnp.pad(b2, (0, LANE - Cout2)).reshape(1, LANE)

    c2 = _coord_channels(Hp, Wp)                                       # (Hp, Wp, 3)
    c2 = jnp.pad(c2, ((0, GRID - Hp), (0, GRID - Wp), (Cout1, LANE - Cout1 - 3)))
    coords2 = jnp.tile(c2.reshape(1, GRID * GRID, LANE),
                       (B, 1, 1)).reshape(B * GRID * GRID, LANE)       # (M, 128)

    # ------------- single fused Pallas kernel (one grid step, everything in VMEM) -----
    M = B * GRID * GRID
    out = pl.pallas_call(
        _fused_net_kernel,
        out_shape=jax.ShapeDtypeStruct((M, LANE), jnp.float32),
        grid_spec=pltpu.PrefetchScalarGridSpec(
            num_scalar_prefetch=0,
            grid=(1,),
            in_specs=[
                pl.BlockSpec((4 * M, LANE), lambda i: (0, 0)),
                pl.BlockSpec((LANE, LANE), lambda i: (0, 0)),
                pl.BlockSpec((1, LANE), lambda i: (0, 0)),
                pl.BlockSpec((M, LANE), lambda i: (0, 0)),
                pl.BlockSpec((9 * LANE, LANE), lambda i: (0, 0)),
                pl.BlockSpec((1, LANE), lambda i: (0, 0)),
            ],
            out_specs=pl.BlockSpec((M, LANE), lambda i: (0, 0)),
            scratch_shapes=[
                pltpu.VMEM((M + 3 * GRID, LANE), jnp.float32),   # layer-2 input (ys)
                pltpu.VMEM((M + 2 * GRID, LANE), jnp.float32),   # layer-2 conv result
            ],
        ),
        compiler_params=pltpu.CompilerParams(dimension_semantics=("arbitrary",)),
    )(pq1, w1p, b1p, coords2, w2cat, b2p)

    # ------------- extract the valid (B, Hp2, Wp2, Cout2) pooled outputs --------------
    Hp2, Wp2 = (Hp - 2) // 2, (Wp - 2) // 2                            # layer-2 pooled HW
    out = out.reshape(B, GRID, GRID, LANE)[:, 0:2 * Hp2:2, 0:2 * Wp2:2, :Cout2]
    return jnp.transpose(out, (0, 3, 1, 2))                            # NCHW


# --------------------------- pure-XLA reference (for self-check) ----------------------
def _coordconv_block_reference(x_nhwc, w_oihw, b):
    B, H, W, _ = x_nhwc.shape
    coords = jnp.broadcast_to(_coord_channels(H, W)[None], (B, H, W, 3))
    xin = jnp.concatenate([coords, x_nhwc], axis=-1)
    y = lax.conv_general_dilated(
        xin, jnp.transpose(w_oihw, (2, 3, 1, 0)).astype(jnp.float32),
        window_strides=(1, 1), padding="VALID",
        dimension_numbers=("NHWC", "HWIO", "NHWC"),
        precision=lax.Precision.HIGHEST)
    y = jnp.maximum(y + b.astype(jnp.float32), 0.0)
    return lax.reduce_window(y, -jnp.inf, lax.max, (1, 2, 2, 1), (1, 2, 2, 1), "VALID")


def _reference_forward(x_nchw, params):
    x = jnp.transpose(x_nchw, (0, 2, 3, 1)).astype(jnp.float32)
    x = _coordconv_block_reference(x, params["w1"], params["b1"])
    x = _coordconv_block_reference(x, params["w2"], params["b2"])
    return jnp.transpose(x, (0, 3, 1, 2))


def init_params(key):
    """Deterministic synthetic init (PyTorch-style uniform bounds). Only conv1/conv2 are
    used by Net.forward."""
    def conv_init(kw, kb, cout, cin, ksz):
        fan_in = cin * ksz * ksz
        bound = float(fan_in) ** -0.5
        w = jax.random.uniform(kw, (cout, cin, ksz, ksz), jnp.float32, -bound, bound)
        b = jax.random.uniform(kb, (cout,), jnp.float32, -bound, bound)
        return w, b

    k1, k2, k3, k4 = jax.random.split(key, 4)
    w1, b1 = conv_init(k1, k2, 100, 3 + 3, 3)      # CoordConv(3, 100, 3, with_r=True)
    w2, b2 = conv_init(k3, k4, 100, 100 + 3, 3)    # CoordConv(100, 100, 3, with_r=True)
    return {"w1": w1, "b1": b1, "w2": w2, "b2": b2}


if __name__ == "__main__":
    key = jax.random.PRNGKey(0)
    kx, kp = jax.random.split(key)
    x = jax.random.normal(kx, (2, 3, 16, 16), dtype=jnp.float32)
    params = init_params(kp)

    out = jax.jit(net_forward)(x, params)
    out = jax.block_until_ready(out)
    assert out.shape == (2, 100, 2, 2), out.shape
    assert out.dtype == jnp.float32

    ref = jax.block_until_ready(jax.jit(_reference_forward)(x, params))
    assert jnp.allclose(out, ref, rtol=5e-3, atol=5e-3), \
        float(jnp.max(jnp.abs(out - ref)))

    print("KERNEL_OK")
</pallas_src>

<mosaic_0001>
module attributes {stable_mosaic.version = 11 : i64} {
  func.func @_fused_net_kernel(%arg0: i32, %arg1: memref<512x128xf32, #tpu.memory_space<vmem>>, %arg2: memref<128x128xf32, #tpu.memory_space<vmem>>, %arg3: memref<1x128xf32, #tpu.memory_space<vmem>>, %arg4: memref<128x128xf32, #tpu.memory_space<vmem>>, %arg5: memref<1152x128xf32, #tpu.memory_space<vmem>>, %arg6: memref<1x128xf32, #tpu.memory_space<vmem>>, %arg7: memref<128x128xf32, #tpu.memory_space<vmem>>, %arg8: memref<152x128xf32, #tpu.memory_space<vmem>>, %arg9: memref<144x128xf32, #tpu.memory_space<vmem>>) attributes {dimension_semantics = [#tpu.dimension_semantics<arbitrary>], iteration_bounds = array<i64: 1>, scalar_prefetch = 0 : i64, scratch_operands = 2 : i64, tpu.core_type = #tpu.core_type<tc>, window_params = [{pipeline_mode = #tpu.pipeline_mode<synchronous>, transform_indices = @transform_0, window_bounds = array<i64: 512, 128>}, {pipeline_mode = #tpu.pipeline_mode<synchronous>, transform_indices = @transform_1, window_bounds = array<i64: 128, 128>}, {pipeline_mode = #tpu.pipeline_mode<synchronous>, transform_indices = @transform_2, window_bounds = array<i64: 1, 128>}, {pipeline_mode = #tpu.pipeline_mode<synchronous>, transform_indices = @transform_3, window_bounds = array<i64: 128, 128>}, {pipeline_mode = #tpu.pipeline_mode<synchronous>, transform_indices = @transform_4, window_bounds = array<i64: 1152, 128>}, {pipeline_mode = #tpu.pipeline_mode<synchronous>, transform_indices = @transform_5, window_bounds = array<i64: 1, 128>}, {pipeline_mode = #tpu.pipeline_mode<synchronous>, transform_indices = @transform_6, window_bounds = array<i64: 128, 128>}]} {
    %c0 = arith.constant 0 : index
    %c0_0 = arith.constant 0 : index
    %0 = vector.load %arg1[%c0, %c0_0] : memref<512x128xf32, #tpu.memory_space<vmem>>, vector<512x128xf32>
    %c0_1 = arith.constant 0 : index
    %c0_2 = arith.constant 0 : index
    %1 = vector.load %arg2[%c0_1, %c0_2] : memref<128x128xf32, #tpu.memory_space<vmem>>, vector<128x128xf32>
    %cst = arith.constant dense<0.000000e+00> : vector<512x128xf32>
    %2 = tpu.matmul %0, %1, %cst {dimension_numbers = #tpu.dot_dimension_numbers<[1], [0], [0], [1], [0, 0, 1, 1], [], []>} : vector<512x128xf32>, vector<128x128xf32>, vector<512x128xf32> -> vector<512x128xf32>
    %3 = vector.extract_strided_slice %2 {offsets = [0, 0], sizes = [128, 128], strides = [1, 1]} : vector<512x128xf32> to vector<128x128xf32>
    %4 = vector.extract_strided_slice %2 {offsets = [128, 0], sizes = [128, 128], strides = [1, 1]} : vector<512x128xf32> to vector<128x128xf32>
    %5 = arith.maximumf %3, %4 : vector<128x128xf32>
    %6 = vector.extract_strided_slice %2 {offsets = [256, 0], sizes = [128, 128], strides = [1, 1]} : vector<512x128xf32> to vector<128x128xf32>
    %7 = vector.extract_strided_slice %2 {offsets = [384, 0], sizes = [128, 128], strides = [1, 1]} : vector<512x128xf32> to vector<128x128xf32>
    %8 = arith.maximumf %6, %7 : vector<128x128xf32>
    %9 = arith.maximumf %5, %8 : vector<128x128xf32>
    %c0_3 = arith.constant 0 : index
    %c0_4 = arith.constant 0 : index
    %10 = vector.load %arg3[%c0_3, %c0_4] : memref<1x128xf32, #tpu.memory_space<vmem>>, vector<1x128xf32>
    %11 = vector.broadcast %10 : vector<1x128xf32> to vector<128x128xf32>
    %12 = arith.addf %9, %11 : vector<128x128xf32>
    %cst_5 = arith.constant 0.000000e+00 : f32
    %13 = vector.broadcast %cst_5 : f32 to vector<128x128xf32>
    %14 = arith.maximumf %12, %13 : vector<128x128xf32>
    %c0_6 = arith.constant 0 : index
    %c0_7 = arith.constant 0 : index
    %15 = vector.load %arg4[%c0_6, %c0_7] : memref<128x128xf32, #tpu.memory_space<vmem>>, vector<128x128xf32>
    %16 = arith.addf %14, %15 : vector<128x128xf32>
    %c0_8 = arith.constant 0 : index
    %c0_9 = arith.constant 0 : index
    %17 = vector.load %arg8[%c0_8, %c0_9] : memref<152x128xf32, #tpu.memory_space<vmem>>, vector<128x128xf32>
    tpu.vector_store %arg8[%c0_8, %c0_9], %16 {strides = array<i32>} : memref<152x128xf32, #tpu.memory_space<vmem>>, vector<128x128xf32>,
    %cst_10 = arith.constant 0.000000e+00 : f32
    %18 = vector.broadcast %cst_10 : f32 to vector<24x128xf32>
    %c128 = arith.constant 128 : index
    %c0_11 = arith.constant 0 : index
    %19 = vector.load %arg8[%c128, %c0_11] : memref<152x128xf32, #tpu.memory_space<vmem>>, vector<24x128xf32>
    tpu.vector_store %arg8[%c128, %c0_11], %18 {strides = array<i32>} : memref<152x128xf32, #tpu.memory_space<vmem>>, vector<24x128xf32>,
    %c0_12 = arith.constant 0 : index
    %c0_13 = arith.constant 0 : index
    %20 = vector.load %arg8[%c0_12, %c0_13] : memref<152x128xf32, #tpu.memory_space<vmem>>, vector<128x128xf32>
    %c1 = arith.constant 1 : index
    %c0_14 = arith.constant 0 : index
    %21 = vector.load %arg8[%c1, %c0_14] : memref<152x128xf32, #tpu.memory_space<vmem>>, vector<128x128xf32>
    %c2 = arith.constant 2 : index
    %c0_15 = arith.constant 0 : index
    %22 = vector.load %arg8[%c2, %c0_15] : memref<152x128xf32, #tpu.memory_space<vmem>>, vector<128x128xf32>
    %c8 = arith.constant 8 : index
    %c0_16 = arith.constant 0 : index
    %23 = vector.load %arg8[%c8, %c0_16] : memref<152x128xf32, #tpu.memory_space<vmem>>, vector<128x128xf32>
    %c9 = arith.constant 9 : index
    %c0_17 = arith.constant 0 : index
    %24 = vector.load %arg8[%c9, %c0_17] : memref<152x128xf32, #tpu.memory_space<vmem>>, vector<128x128xf32>
    %c10 = arith.constant 10 : index
    %c0_18 = arith.constant 0 : index
    %25 = vector.load %arg8[%c10, %c0_18] : memref<152x128xf32, #tpu.memory_space<vmem>>, vector<128x128xf32>
    %c16 = arith.constant 16 : index
    %c0_19 = arith.constant 0 : index
    %26 = vector.load %arg8[%c16, %c0_19] : memref<152x128xf32, #tpu.memory_space<vmem>>, vector<128x128xf32>
    %c17 = arith.constant 17 : index
    %c0_20 = arith.constant 0 : index
    %27 = vector.load %arg8[%c17, %c0_20] : memref<152x128xf32, #tpu.memory_space<vmem>>, vector<128x128xf32>
    %c18 = arith.constant 18 : index
    %c0_21 = arith.constant 0 : index
    %28 = vector.load %arg8[%c18, %c0_21] : memref<152x128xf32, #tpu.memory_space<vmem>>, vector<128x128xf32>
    %29 = tpu.concatenate %20, %21, %22, %23, %24, %25, %26, %27, %28 in 1 : vector<128x128xf32>, vector<128x128xf32>, vector<128x128xf32>, vector<128x128xf32>, vector<128x128xf32>, vector<128x128xf32>, vector<128x128xf32>, vector<128x128xf32>, vector<128x128xf32> -> vector<128x1152xf32>
    %c0_22 = arith.constant 0 : index
    %c0_23 = arith.constant 0 : index
    %30 = vector.load %arg5[%c0_22, %c0_23] : memref<1152x128xf32, #tpu.memory_space<vmem>>, vector<1152x128xf32>
    %cst_24 = arith.constant dense<0.000000e+00> : vector<128x128xf32>
    %31 = tpu.matmul %29, %30, %cst_24 {dimension_numbers = #tpu.dot_dimension_numbers<[1], [0], [0], [1], [0, 0, 1, 1], [], []>} : vector<128x1152xf32>, vector<1152x128xf32>, vector<128x128xf32> -> vector<128x128xf32>
    %c0_25 = arith.constant 0 : index
    %c0_26 = arith.constant 0 : index
    %32 = vector.load %arg9[%c0_25, %c0_26] : memref<144x128xf32, #tpu.memory_space<vmem>>, vector<128x128xf32>
    tpu.vector_store %arg9[%c0_25, %c0_26], %31 {strides = array<i32>} : memref<144x128xf32, #tpu.memory_space<vmem>>, vector<128x128xf32>,
    %cst_27 = arith.constant 0.000000e+00 : f32
    %33 = vector.broadcast %cst_27 : f32 to vector<16x128xf32>
    %c128_28 = arith.constant 128 : index
    %c0_29 = arith.constant 0 : index
    %34 = vector.load %arg9[%c128_28, %c0_29] : memref<144x128xf32, #tpu.memory_space<vmem>>, vector<16x128xf32>
    tpu.vector_store %arg9[%c128_28, %c0_29], %33 {strides = array<i32>} : memref<144x128xf32, #tpu.memory_space<vmem>>, vector<16x128xf32>,
    %c0_30 = arith.constant 0 : index
    %c0_31 = arith.constant 0 : index
    %35 = vector.load %arg9[%c0_30, %c0_31] : memref<144x128xf32, #tpu.memory_space<vmem>>, vector<128x128xf32>
    %c1_32 = arith.constant 1 : index
    %c0_33 = arith.constant 0 : index
    %36 = vector.load %arg9[%c1_32, %c0_33] : memref<144x128xf32, #tpu.memory_space<vmem>>, vector<128x128xf32>
    %37 = arith.maximumf %35, %36 : vector<128x128xf32>
    %c8_34 = arith.constant 8 : index
    %c0_35 = arith.constant 0 : index
    %38 = vector.load %arg9[%c8_34, %c0_35] : memref<144x128xf32, #tpu.memory_space<vmem>>, vector<128x128xf32>
    %c9_36 = arith.constant 9 : index
    %c0_37 = arith.constant 0 : index
    %39 = vector.load %arg9[%c9_36, %c0_37] : memref<144x128xf32, #tpu.memory_space<vmem>>, vector<128x128xf32>
    %40 = arith.maximumf %38, %39 : vector<128x128xf32>
    %41 = arith.maximumf %37, %40 : vector<128x128xf32>
    %c0_38 = arith.constant 0 : index
    %c0_39 = arith.constant 0 : index
    %42 = vector.load %arg6[%c0_38, %c0_39] : memref<1x128xf32, #tpu.memory_space<vmem>>, vector<1x128xf32>
    %43 = vector.broadcast %42 : vector<1x128xf32> to vector<128x128xf32>
    %44 = arith.addf %41, %43 : vector<128x128xf32>
    %cst_40 = arith.constant 0.000000e+00 : f32
    %45 = vector.broadcast %cst_40 : f32 to vector<128x128xf32>
    %46 = arith.maximumf %44, %45 : vector<128x128xf32>
    %c0_41 = arith.constant 0 : index
    %c0_42 = arith.constant 0 : index
    %47 = vector.load %arg7[%c0_41, %c0_42] : memref<128x128xf32, #tpu.memory_space<vmem>>, vector<128x128xf32>
    tpu.vector_store %arg7[%c0_41, %c0_42], %46 {strides = array<i32>} : memref<128x128xf32, #tpu.memory_space<vmem>>, vector<128x128xf32>,
    return
  }
  func.func @transform_0(%arg0: i32) -> (i32, i32) {
    %c0_i32 = arith.constant 0 : i32
    %c0_i32_0 = arith.constant 0 : i32
    %c0_i32_1 = arith.constant 0 : i32
    return %c0_i32, %c0_i32_0 : i32, i32
  }
  func.func @transform_1(%arg0: i32) -> (i32, i32) {
    %c0_i32 = arith.constant 0 : i32
    %c0_i32_0 = arith.constant 0 : i32
    %c0_i32_1 = arith.constant 0 : i32
    return %c0_i32, %c0_i32_0 : i32, i32
  }
  func.func @transform_2(%arg0: i32) -> (i32, i32) {
    %c0_i32 = arith.constant 0 : i32
    %c0_i32_0 = arith.constant 0 : i32
    %c0_i32_1 = arith.constant 0 : i32
    return %c0_i32, %c0_i32_0 : i32, i32
  }
  func.func @transform_3(%arg0: i32) -> (i32, i32) {
    %c0_i32 = arith.constant 0 : i32
    %c0_i32_0 = arith.constant 0 : i32
    %c0_i32_1 = arith.constant 0 : i32
    return %c0_i32, %c0_i32_0 : i32, i32
  }
  func.func @transform_4(%arg0: i32) -> (i32, i32) {
    %c0_i32 = arith.constant 0 : i32
    %c0_i32_0 = arith.constant 0 : i32
    %c0_i32_1 = arith.constant 0 : i32
    return %c0_i32, %c0_i32_0 : i32, i32
  }
  func.func @transform_5(%arg0: i32) -> (i32, i32) {
    %c0_i32 = arith.constant 0 : i32
    %c0_i32_0 = arith.constant 0 : i32
    %c0_i32_1 = arith.constant 0 : i32
    return %c0_i32, %c0_i32_0 : i32, i32
  }
  func.func @transform_6(%arg0: i32) -> (i32, i32) {
    %c0_i32 = arith.constant 0 : i32
    %c0_i32_0 = arith.constant 0 : i32
    %c0_i32_1 = arith.constant 0 : i32
    return %c0_i32, %c0_i32_0 : i32, i32
  }
}

</mosaic_0001>

<bundles_post_ra>
// kernel: net_forward.1
= control target key start
LH: loop header
LB: loop body
LE: loop exit
PB: predicated region body
PF: predicated region fallthrough
CT: control target
= control target key end

     0   :  { %s3856_s1 = inlined_call_operand.vmem [shape: f32[128,128], index: 1, kind: input, shape index: {}]   ;;  %s3857_s0 = inlined_call_operand.vmem [shape: f32[512,128], index: 0, kind: input, shape index: {}]   ;;  %s3858_s4 = inlined_call_operand.vmem [shape: f32[1152,128], index: 4, kind: input, shape index: {}]   ;;  %s3859_s2 = inlined_call_operand.vmem [shape: f32[1,128], index: 2, kind: input, shape index: {}]   ;;  %s3860_s3 = inlined_call_operand.vmem [shape: f32[128,128], index: 3, kind: input, shape index: {}]   ;;  %s3861_s5 = inlined_call_operand.vmem [shape: f32[1,128], index: 5, kind: input, shape index: {}]   ;;  %s3862_s6 = inlined_call_operand.vmem [shape: f32[128,128], index: 6, kind: output, shape index: {}]  }
   0x1   :  { %v102_v0 = vld [vmem:[%s3856_s1 + $0x78] sm:$0xff]  ;;  %v101_v1 = vld [vmem:[%s3856_s1 + $0x70] sm:$0xff]  ;;  %v100_v2 = vld [vmem:[%s3856_s1 + $0x68] sm:$0xff] }
   0x2   :  { %2127 = vmatprep.subr.mxu0 %v102_v0  ;;  %v99_v3 = vld [vmem:[%s3856_s1 + $0x60] sm:$0xff]  ;;  %v98_v5 = vld [vmem:[%s3856_s1 + $0x58] sm:$0xff]  ;;  %v97_v6 = vld [vmem:[%s3856_s1 + $0x50] sm:$0xff] }
   0x3   :  { %2128 = vmatpush3.msra.mxu0 %v102_v0  ;;  %v23_v4 = vld [vmem:[%s3857_s0] sm:$0xff]  ;;  %v96_v7 = vld [vmem:[%s3856_s1 + $0x48] sm:$0xff]  ;;  %v94_v9 = vld [vmem:[%s3856_s1 + $0x38] sm:$0xff] }
   0x4   :  { %2129 = vmatprep.subr.mxu0 %v101_v1  ;;  %2159 = vmatprep.mubr.f32.mxu0 %v23_v4  ;;  %v95_v8 = vld [vmem:[%s3856_s1 + $0x40] sm:$0xff]  ;;  %v93_v10 = vld [vmem:[%s3856_s1 + $0x30] sm:$0xff]  ;;  %v92_v11 = vld [vmem:[%s3856_s1 + $0x28] sm:$0xff] }
   0x5   :  { %2130 = vmatpush3.msra.mxu0 %v101_v1  ;;  %v91_v12 = vld [vmem:[%s3856_s1 + $0x20] sm:$0xff]  ;;  %v90_v13 = vld [vmem:[%s3856_s1 + $0x18] sm:$0xff]  ;;  %v89_v14 = vld [vmem:[%s3856_s1 + $0x10] sm:$0xff] }
   0x6   :  { %2131 = vmatprep.subr.mxu0 %v100_v2  ;;  %v88_v15 = vld [vmem:[%s3856_s1 + $0x8] sm:$0xff]  ;;  %v87_v16 = vld [vmem:[%s3856_s1] sm:$0xff]  ;;  %v25_v18 = vld [vmem:[%s3857_s0 + $0x10] sm:$0xff] }
   0x7   :  { %2132 = vmatpush3.msra.mxu0 %v100_v2  ;;  %v24_v17 = vld [vmem:[%s3857_s0 + $0x8] sm:$0xff]  ;;  %v26_v19 = vld [vmem:[%s3857_s0 + $0x18] sm:$0xff]  ;;  %v27_v20 = vld [vmem:[%s3857_s0 + $0x20] sm:$0xff] }
   0x8   :  { %2133 = vmatprep.subr.mxu0 %v99_v3  ;;  %v28_v21 = vld [vmem:[%s3857_s0 + $0x28] sm:$0xff]  ;;  %v29_v22 = vld [vmem:[%s3857_s0 + $0x30] sm:$0xff]  ;;  %v30_v23 = vld [vmem:[%s3857_s0 + $0x38] sm:$0xff] }
   0x9   :  { %2134 = vmatpush3.msra.mxu0 %v99_v3  ;;  %v31_v24 = vld [vmem:[%s3857_s0 + $0x40] sm:$0xff]  ;;  %v32_v25 = vld [vmem:[%s3857_s0 + $0x48] sm:$0xff]  ;;  %v33_v26 = vld [vmem:[%s3857_s0 + $0x50] sm:$0xff] }
   0xa   :  { %2135 = vmatprep.subr.mxu0 %v98_v5  ;;  %v34_v27 = vld [vmem:[%s3857_s0 + $0x58] sm:$0xff]  ;;  %v35_v28 = vld [vmem:[%s3857_s0 + $0x60] sm:$0xff]  ;;  %v36_v29 = vld [vmem:[%s3857_s0 + $0x68] sm:$0xff] }
   0xb   :  { %2136 = vmatpush3.msra.mxu0 %v98_v5  ;;  %v37_v30 = vld [vmem:[%s3857_s0 + $0x70] sm:$0xff]  ;;  %v38_v31 = vld [vmem:[%s3857_s0 + $0x78] sm:$0xff]  ;;  %v39_v32 = vld [vmem:[%s3857_s0 + $0x80] sm:$0xff] }
   0xc   :  { %2137 = vmatprep.subr.mxu0 %v97_v6  ;;  %v40_v33 = vld [vmem:[%s3857_s0 + $0x88] sm:$0xff]  ;;  %v41_v34 = vld [vmem:[%s3857_s0 + $0x90] sm:$0xff]  ;;  %v42_v35 = vld [vmem:[%s3857_s0 + $0x98] sm:$0xff] }
   0xd   :  { %2138 = vmatpush3.msra.mxu0 %v97_v6  ;;  %v43_v36 = vld [vmem:[%s3857_s0 + $0xa0] sm:$0xff]  ;;  %v44_v37 = vld [vmem:[%s3857_s0 + $0xa8] sm:$0xff]  ;;  %v45_v38 = vld [vmem:[%s3857_s0 + $0xb0] sm:$0xff] }
   0xe   :  { %2139 = vmatprep.subr.mxu0 %v96_v7  ;;  %v46_v39 = vld [vmem:[%s3857_s0 + $0xb8] sm:$0xff]  ;;  %v47_v40 = vld [vmem:[%s3857_s0 + $0xc0] sm:$0xff]  ;;  %v48_v41 = vld [vmem:[%s3857_s0 + $0xc8] sm:$0xff] }
   0xf   :  { %2140 = vmatpush3.msra.mxu0 %v96_v7  ;;  %v49_v42 = vld [vmem:[%s3857_s0 + $0xd0] sm:$0xff]  ;;  %v50_v43 = vld [vmem:[%s3857_s0 + $0xd8] sm:$0xff]  ;;  %v51_v44 = vld [vmem:[%s3857_s0 + $0xe0] sm:$0xff] }
  0x10   :  { %2141 = vmatprep.subr.mxu0 %v95_v8  ;;  %v52_v45 = vld [vmem:[%s3857_s0 + $0xe8] sm:$0xff]  ;;  %v53_v46 = vld [vmem:[%s3857_s0 + $0xf0] sm:$0xff]  ;;  %v54_v47 = vld [vmem:[%s3857_s0 + $0xf8] sm:$0xff] }
  0x11   :  { %2142 = vmatpush3.msra.mxu0 %v95_v8  ;;  %v55_v48 = vld [vmem:[%s3857_s0 + $0x100] sm:$0xff]  ;;  %v56_v49 = vld [vmem:[%s3857_s0 + $0x108] sm:$0xff]  ;;  %v57_v50 = vld [vmem:[%s3857_s0 + $0x110] sm:$0xff] }
  0x12   :  { %2143 = vmatprep.subr.mxu0 %v94_v9  ;;  %v58_v51 = vld [vmem:[%s3857_s0 + $0x118] sm:$0xff]  ;;  %v59_v52 = vld [vmem:[%s3857_s0 + $0x120] sm:$0xff]  ;;  %v60_v53 = vld [vmem:[%s3857_s0 + $0x128] sm:$0xff] }
  0x13   :  { %2144 = vmatpush3.msra.mxu0 %v94_v9  ;;  %v61_v54 = vld [vmem:[%s3857_s0 + $0x130] sm:$0xff]  ;;  %v62_v55 = vld [vmem:[%s3857_s0 + $0x138] sm:$0xff]  ;;  %v63_v56 = vld [vmem:[%s3857_s0 + $0x140] sm:$0xff] }
  0x14   :  { %2145 = vmatprep.subr.mxu0 %v93_v10  ;;  %v64_v57 = vld [vmem:[%s3857_s0 + $0x148] sm:$0xff]  ;;  %v65_v58 = vld [vmem:[%s3857_s0 + $0x150] sm:$0xff]  ;;  %v66_v59 = vld [vmem:[%s3857_s0 + $0x158] sm:$0xff] }
  0x15   :  { %2146 = vmatpush3.msra.mxu0 %v93_v10  ;;  %v67_v60 = vld [vmem:[%s3857_s0 + $0x160] sm:$0xff]  ;;  %v68_v61 = vld [vmem:[%s3857_s0 + $0x168] sm:$0xff]  ;;  %v69_v62 = vld [vmem:[%s3857_s0 + $0x170] sm:$0xff] }
  0x16   :  { %2147 = vmatprep.subr.mxu0 %v92_v11  ;;  %v70_v63 = vld [vmem:[%s3857_s0 + $0x178] sm:$0xff]  ;;  %v71_v0 = vld [vmem:[%s3857_s0 + $0x180] sm:$0xff]  ;;  %v72_v1 = vld [vmem:[%s3857_s0 + $0x188] sm:$0xff] }
  0x17   :  { %2148 = vmatpush3.msra.mxu0 %v92_v11  ;;  %v73_v2 = vld [vmem:[%s3857_s0 + $0x190] sm:$0xff]  ;;  %v74_v3 = vld [vmem:[%s3857_s0 + $0x198] sm:$0xff]  ;;  %v75_v4 = vld [vmem:[%s3857_s0 + $0x1a0] sm:$0xff] }
  0x18   :  { %2149 = vmatprep.subr.mxu0 %v91_v12  ;;  %v76_v5 = vld [vmem:[%s3857_s0 + $0x1a8] sm:$0xff]  ;;  %v77_v6 = vld [vmem:[%s3857_s0 + $0x1b0] sm:$0xff]  ;;  %v78_v7 = vld [vmem:[%s3857_s0 + $0x1b8] sm:$0xff] }
  0x19   :  { %2150 = vmatpush3.msra.mxu0 %v91_v12  ;;  %v79_v8 = vld [vmem:[%s3857_s0 + $0x1c0] sm:$0xff]  ;;  %v80_v9 = vld [vmem:[%s3857_s0 + $0x1c8] sm:$0xff]  ;;  %v81_v10 = vld [vmem:[%s3857_s0 + $0x1d0] sm:$0xff] }
  0x1a   :  { %2151 = vmatprep.subr.mxu0 %v90_v13  ;;  %v82_v11 = vld [vmem:[%s3857_s0 + $0x1d8] sm:$0xff]  ;;  %v83_v12 = vld [vmem:[%s3857_s0 + $0x1e0] sm:$0xff] }
  0x1b   :  { %2152 = vmatpush3.msra.mxu0 %v90_v13  ;;  %v84_v13 = vld [vmem:[%s3857_s0 + $0x1e8] sm:$0xff] }
  0x1c   :  { %2153 = vmatprep.subr.mxu0 %v89_v14 }
  0x1d   :  { %2154 = vmatpush3.msra.mxu0 %v89_v14  ;;  %v85_v14 = vld [vmem:[%s3857_s0 + $0x1f0] sm:$0xff] }
  0x1e   :  { %2155 = vmatprep.subr.mxu0 %v88_v15 }
  0x1f   :  { %2156 = vmatpush3.msra.mxu0 %v88_v15  ;;  %v86_v15 = vld [vmem:[%s3857_s0 + $0x1f8] sm:$0xff] }
  0x20   :  { %2157 = vmatprep.subr.mxu0 %v87_v16 }
  0x21   :  { %2158 = vmatpush3.msra.mxu0 %v87_v16  ;;  %v711_v16 = vld [vmem:[%s3858_s4 + $0xf8] sm:$0xff] }
  0x22   :  { %2160 = vmatmul.mubr.f32.vlgmr.msra.gmra.mxu0 %v24_v17  ;;  %1775 = vmatprep.subr.mxu1 %v711_v16  ;;  %v695_v17 = vld [vmem:[%s3858_s4 + $0x78] sm:$0xff] }
  0x23   :  { %2162 = vmatprep.mubr.f32.mxu0 %v25_v18  ;;  %v710_v18 = vld [vmem:[%s3858_s4 + $0xf0] sm:$0xff]  ;;  %1776 = vmatpush3.msra.mxu1 %v695_v17  ;;  %v743_v16 = vld [vmem:[%s3858_s4 + $0x1f8] sm:$0xff] }
  0x24   :  { %1777 = vmatprep.subr.mxu1 %v710_v18 }
  0x26   :  { %2163 = vmatmul.mubr.f32.gmra.mxu0 %v26_v19  ;;  %v694_v19 = vld [vmem:[%s3858_s4 + $0x70] sm:$0xff] }
  0x27   :  { %2165 = vmatprep.mubr.f32.mxu0 %v27_v20  ;;  %v709_v20 = vld [vmem:[%s3858_s4 + $0xe8] sm:$0xff]  ;;  %1778 = vmatpush3.msra.mxu1 %v694_v19 }
  0x28   :  { %1779 = vmatprep.subr.mxu1 %v709_v20 }
  0x2a   :  { %2166 = vmatmul.mubr.f32.gmra.mxu0 %v28_v21  ;;  %v775_v21 = vld [vmem:[%s3858_s4 + $0x2f8] sm:$0xff] }
  0x2b   :  { %2168 = vmatprep.mubr.f32.mxu0 %v29_v22  ;;  %v693_v22 = vld [vmem:[%s3858_s4 + $0x68] sm:$0xff]  ;;  %1935 = vmatprep.subr.mxu0 %v775_v21 }
  0x2c   :  { %1780 = vmatpush3.msra.mxu1 %v693_v22  ;;  %v3863_v22 = vmov 0.0  }
  0x2d   :  { %623 = vst [vmem:[#allocation2 + $0x80] sm:$0xff] %v3863_v22  ;;  %1565 = vst [vmem:[#allocation3 + $0x80] sm:$0xff] %v3863_v22 }
  0x2e   :  { %2169 = vmatmul.mubr.f32.gmra.mxu0 %v30_v23  ;;  %v708_v23 = vld [vmem:[%s3858_s4 + $0xe0] sm:$0xff]  ;;  %1566 = vst [vmem:[#allocation3 + $0x88] sm:$0xff] %v3863_v22  ;;  %624 = vst [vmem:[#allocation2 + $0x88] sm:$0xff] %v3863_v22 }
  0x2f   :  { %2171 = vmatprep.mubr.f32.mxu0 %v31_v24  ;;  %v759_v24 = vld [vmem:[%s3858_s4 + $0x278] sm:$0xff]  ;;  %1781 = vmatprep.subr.mxu1 %v708_v23  ;;  %625 = vst [vmem:[#allocation2 + $0x90] sm:$0xff] %v3863_v22 }
  0x30   :  { %1936 = vmatpush3.msra.mxu0 %v759_v24 }
  0x32   :  { %2172 = vmatmul.mubr.f32.gmra.mxu0 %v32_v25  ;;  %v774_v25 = vld [vmem:[%s3858_s4 + $0x2f0] sm:$0xff] }
  0x33   :  { %2174 = vmatprep.mubr.f32.mxu0 %v33_v26  ;;  %v692_v26 = vld [vmem:[%s3858_s4 + $0x60] sm:$0xff]  ;;  %1937 = vmatprep.subr.mxu0 %v774_v25 }
  0x34   :  { %1782 = vmatpush3.msra.mxu1 %v692_v26 }
  0x36   :  { %2175 = vmatmul.mubr.f32.gmra.mxu0 %v34_v27  ;;  %v707_v27 = vld [vmem:[%s3858_s4 + $0xd8] sm:$0xff] }
  0x37   :  { %2177 = vmatprep.mubr.f32.mxu0 %v35_v28  ;;  %v758_v28 = vld [vmem:[%s3858_s4 + $0x270] sm:$0xff]  ;;  %1783 = vmatprep.subr.mxu1 %v707_v27 }
  0x38   :  { %1938 = vmatpush3.msra.mxu0 %v758_v28 }
  0x3a   :  { %2178 = vmatmul.mubr.f32.gmra.mxu0 %v36_v29  ;;  %v773_v29 = vld [vmem:[%s3858_s4 + $0x2e8] sm:$0xff] }
  0x3b   :  { %2180 = vmatprep.mubr.f32.mxu0 %v37_v30  ;;  %v691_v30 = vld [vmem:[%s3858_s4 + $0x58] sm:$0xff]  ;;  %1939 = vmatprep.subr.mxu0 %v773_v29 }
  0x3c   :  { %1784 = vmatpush3.msra.mxu1 %v691_v30 }
  0x3e   :  { %2181 = vmatmul.mubr.f32.gmra.mxu0 %v38_v31  ;;  %v706_v31 = vld [vmem:[%s3858_s4 + $0xd0] sm:$0xff] }
  0x3f   :  { %2183 = vmatprep.mubr.f32.mxu0 %v39_v32  ;;  %v757_v32 = vld [vmem:[%s3858_s4 + $0x268] sm:$0xff]  ;;  %1785 = vmatprep.subr.mxu1 %v706_v31 }
  0x40   :  { %1940 = vmatpush3.msra.mxu0 %v757_v32  ;;  %v2852_v32 = vld [vmem:[%s3858_s4 + $0x478] sm:$0xff] }
  0x42   :  { %2184 = vmatmul.mubr.f32.gmra.mxu0 %v40_v33  ;;  %v772_v33 = vld [vmem:[%s3858_s4 + $0x2e0] sm:$0xff] }
  0x43   :  { %2186 = vmatprep.mubr.f32.mxu0 %v41_v34  ;;  %v690_v34 = vld [vmem:[%s3858_s4 + $0x50] sm:$0xff]  ;;  %1941 = vmatprep.subr.mxu0 %v772_v33 }
  0x44   :  { %1786 = vmatpush3.msra.mxu1 %v690_v34 }
  0x46   :  { %2187 = vmatmul.mubr.f32.gmra.mxu0 %v42_v35  ;;  %v756_v35 = vld [vmem:[%s3858_s4 + $0x260] sm:$0xff] }
  0x47   :  { %2189 = vmatprep.mubr.f32.mxu0 %v43_v36  ;;  %v705_v36 = vld [vmem:[%s3858_s4 + $0xc8] sm:$0xff]  ;;  %1942 = vmatpush3.msra.mxu0 %v756_v35 }
  0x48   :  { %1787 = vmatprep.subr.mxu1 %v705_v36 }
  0x4a   :  { %2190 = vmatmul.mubr.f32.gmra.mxu0 %v44_v37  ;;  %v771_v37 = vld [vmem:[%s3858_s4 + $0x2d8] sm:$0xff] }
  0x4b   :  { %2192 = vmatprep.mubr.f32.mxu0 %v45_v38  ;;  %v689_v38 = vld [vmem:[%s3858_s4 + $0x48] sm:$0xff]  ;;  %1943 = vmatprep.subr.mxu0 %v771_v37 }
  0x4c   :  { %1788 = vmatpush3.msra.mxu1 %v689_v38 }
  0x4e   :  { %2193 = vmatmul.mubr.f32.gmra.mxu0 %v46_v39  ;;  %v755_v39 = vld [vmem:[%s3858_s4 + $0x258] sm:$0xff] }
  0x4f   :  { %2195 = vmatprep.mubr.f32.mxu0 %v47_v40  ;;  %v704_v40 = vld [vmem:[%s3858_s4 + $0xc0] sm:$0xff]  ;;  %1944 = vmatpush3.msra.mxu0 %v755_v39 }
  0x50   :  { %1789 = vmatprep.subr.mxu1 %v704_v40 }
  0x52   :  { %2196 = vmatmul.mubr.f32.gmra.mxu0 %v48_v41  ;;  %v770_v41 = vld [vmem:[%s3858_s4 + $0x2d0] sm:$0xff] }
  0x53   :  { %2198 = vmatprep.mubr.f32.mxu0 %v49_v42  ;;  %v688_v42 = vld [vmem:[%s3858_s4 + $0x40] sm:$0xff]  ;;  %1945 = vmatprep.subr.mxu0 %v770_v41 }
  0x54   :  { %1790 = vmatpush3.msra.mxu1 %v688_v42 }
  0x56   :  { %2199 = vmatmul.mubr.f32.gmra.mxu0 %v50_v43  ;;  %v754_v43 = vld [vmem:[%s3858_s4 + $0x250] sm:$0xff] }
  0x57   :  { %2201 = vmatprep.mubr.f32.mxu0 %v51_v44  ;;  %v703_v44 = vld [vmem:[%s3858_s4 + $0xb8] sm:$0xff]  ;;  %1946 = vmatpush3.msra.mxu0 %v754_v43 }
  0x58   :  { %1791 = vmatprep.subr.mxu1 %v703_v44 }
  0x5a   :  { %2202 = vmatmul.mubr.f32.gmra.mxu0 %v52_v45  ;;  %v769_v45 = vld [vmem:[%s3858_s4 + $0x2c8] sm:$0xff] }
  0x5b   :  { %2204 = vmatprep.mubr.f32.mxu0 %v53_v46  ;;  %v687_v46 = vld [vmem:[%s3858_s4 + $0x38] sm:$0xff]  ;;  %1947 = vmatprep.subr.mxu0 %v769_v45 }
  0x5c   :  { %1792 = vmatpush3.msra.mxu1 %v687_v46 }
  0x5e   :  { %2205 = vmatmul.mubr.f32.gmra.mxu0 %v54_v47  ;;  %v753_v47 = vld [vmem:[%s3858_s4 + $0x248] sm:$0xff] }
  0x5f   :  { %2207 = vmatprep.mubr.f32.mxu0 %v55_v48  ;;  %v702_v48 = vld [vmem:[%s3858_s4 + $0xb0] sm:$0xff]  ;;  %1948 = vmatpush3.msra.mxu0 %v753_v47 }
  0x60   :  { %1793 = vmatprep.subr.mxu1 %v702_v48 }
  0x62   :  { %2208 = vmatmul.mubr.f32.gmra.mxu0 %v56_v49  ;;  %v768_v49 = vld [vmem:[%s3858_s4 + $0x2c0] sm:$0xff] }
  0x63   :  { %2210 = vmatprep.mubr.f32.mxu0 %v57_v50  ;;  %v686_v50 = vld [vmem:[%s3858_s4 + $0x30] sm:$0xff]  ;;  %1949 = vmatprep.subr.mxu0 %v768_v49 }
  0x64   :  { %1794 = vmatpush3.msra.mxu1 %v686_v50 }
  0x66   :  { %2211 = vmatmul.mubr.f32.gmra.mxu0 %v58_v51  ;;  %v752_v51 = vld [vmem:[%s3858_s4 + $0x240] sm:$0xff] }
  0x67   :  { %2213 = vmatprep.mubr.f32.mxu0 %v59_v52  ;;  %v701_v52 = vld [vmem:[%s3858_s4 + $0xa8] sm:$0xff]  ;;  %1950 = vmatpush3.msra.mxu0 %v752_v51 }
  0x68   :  { %1795 = vmatprep.subr.mxu1 %v701_v52 }
  0x6a   :  { %2214 = vmatmul.mubr.f32.gmra.mxu0 %v60_v53  ;;  %v767_v53 = vld [vmem:[%s3858_s4 + $0x2b8] sm:$0xff] }
  0x6b   :  { %2216 = vmatprep.mubr.f32.mxu0 %v61_v54  ;;  %v685_v54 = vld [vmem:[%s3858_s4 + $0x28] sm:$0xff]  ;;  %1951 = vmatprep.subr.mxu0 %v767_v53 }
  0x6c   :  { %1796 = vmatpush3.msra.mxu1 %v685_v54 }
  0x6e   :  { %2217 = vmatmul.mubr.f32.gmra.mxu0 %v62_v55  ;;  %v751_v55 = vld [vmem:[%s3858_s4 + $0x238] sm:$0xff] }
  0x6f   :  { %2219 = vmatprep.mubr.f32.mxu0 %v63_v56  ;;  %v700_v56 = vld [vmem:[%s3858_s4 + $0xa0] sm:$0xff]  ;;  %1952 = vmatpush3.msra.mxu0 %v751_v55 }
  0x70   :  { %1797 = vmatprep.subr.mxu1 %v700_v56  ;;  %v576_v56 = vld [vmem:[%s3860_s3 + $0x8] sm:$0xff] }
  0x72   :  { %2220 = vmatmul.mubr.f32.gmra.mxu0 %v64_v57  ;;  %v766_v57 = vld [vmem:[%s3858_s4 + $0x2b0] sm:$0xff] }
  0x73   :  { %2222 = vmatprep.mubr.f32.mxu0 %v65_v58  ;;  %v684_v58 = vld [vmem:[%s3858_s4 + $0x20] sm:$0xff]  ;;  %1953 = vmatprep.subr.mxu0 %v766_v57 }
  0x74   :  { %1798 = vmatpush3.msra.mxu1 %v684_v58 }
  0x76   :  { %2223 = vmatmul.mubr.f32.gmra.mxu0 %v66_v59  ;;  %v750_v59 = vld [vmem:[%s3858_s4 + $0x230] sm:$0xff] }
  0x77   :  { %2225 = vmatprep.mubr.f32.mxu0 %v67_v60  ;;  %v699_v60 = vld [vmem:[%s3858_s4 + $0x98] sm:$0xff]  ;;  %1954 = vmatpush3.msra.mxu0 %v750_v59 }
  0x78   :  { %1799 = vmatprep.subr.mxu1 %v699_v60 }
  0x7a   :  { %2226 = vmatmul.mubr.f32.gmra.mxu0 %v68_v61  ;;  %v765_v61 = vld [vmem:[%s3858_s4 + $0x2a8] sm:$0xff] }
  0x7b   :  { %2228 = vmatprep.mubr.f32.mxu0 %v69_v62  ;;  %v683_v62 = vld [vmem:[%s3858_s4 + $0x18] sm:$0xff]  ;;  %1955 = vmatprep.subr.mxu0 %v765_v61 }
  0x7c   :  { %1800 = vmatpush3.msra.mxu1 %v683_v62 }
  0x7e   :  { %2229 = vmatmul.mubr.f32.gmra.mxu0 %v70_v63  ;;  %v749_v63 = vld [vmem:[%s3858_s4 + $0x228] sm:$0xff] }
  0x7f   :  { %2231 = vmatprep.mubr.f32.mxu0 %v71_v0  ;;  %v698_v0 = vld [vmem:[%s3858_s4 + $0x90] sm:$0xff]  ;;  %1956 = vmatpush3.msra.mxu0 %v749_v63 }
  0x80   :  { %1801 = vmatprep.subr.mxu1 %v698_v0 }
  0x82   :  { %2232 = vmatmul.mubr.f32.gmra.mxu0 %v72_v1  ;;  %v764_v1 = vld [vmem:[%s3858_s4 + $0x2a0] sm:$0xff] }
  0x83   :  { %2234 = vmatprep.mubr.f32.mxu0 %v73_v2  ;;  %v682_v2 = vld [vmem:[%s3858_s4 + $0x10] sm:$0xff]  ;;  %1957 = vmatprep.subr.mxu0 %v764_v1 }
  0x84   :  { %1802 = vmatpush3.msra.mxu1 %v682_v2 }
  0x86   :  { %2235 = vmatmul.mubr.f32.gmra.mxu0 %v74_v3  ;;  %v748_v3 = vld [vmem:[%s3858_s4 + $0x220] sm:$0xff] }
  0x87   :  { %2237 = vmatprep.mubr.f32.mxu0 %v75_v4  ;;  %v697_v4 = vld [vmem:[%s3858_s4 + $0x88] sm:$0xff]  ;;  %1958 = vmatpush3.msra.mxu0 %v748_v3 }
  0x88   :  { %1803 = vmatprep.subr.mxu1 %v697_v4 }
  0x8a   :  { %2238 = vmatmul.mubr.f32.gmra.mxu0 %v76_v5  ;;  %v763_v5 = vld [vmem:[%s3858_s4 + $0x298] sm:$0xff] }
  0x8b   :  { %2240 = vmatprep.mubr.f32.mxu0 %v77_v6  ;;  %v681_v6 = vld [vmem:[%s3858_s4 + $0x8] sm:$0xff]  ;;  %1959 = vmatprep.subr.mxu0 %v763_v5 }
  0x8c   :  { %1804 = vmatpush3.msra.mxu1 %v681_v6 }
  0x8e   :  { %2241 = vmatmul.mubr.f32.gmra.mxu0 %v78_v7  ;;  %v747_v7 = vld [vmem:[%s3858_s4 + $0x218] sm:$0xff] }
  0x8f   :  { %2243 = vmatprep.mubr.f32.mxu0 %v79_v8  ;;  %v696_v8 = vld [vmem:[%s3858_s4 + $0x80] sm:$0xff]  ;;  %1960 = vmatpush3.msra.mxu0 %v747_v7 }
  0x90   :  { %1805 = vmatprep.subr.mxu1 %v696_v8 }
  0x92   :  { %2244 = vmatmul.mubr.f32.gmra.mxu0 %v80_v9  ;;  %v762_v9 = vld [vmem:[%s3858_s4 + $0x290] sm:$0xff] }
  0x93   :  { %2246 = vmatprep.mubr.f32.mxu0 %v81_v10  ;;  %v680_v10 = vld [vmem:[%s3858_s4] sm:$0xff]  ;;  %1961 = vmatprep.subr.mxu0 %v762_v9 }
  0x94   :  { %1806 = vmatpush3.msra.mxu1 %v680_v10 }
  0x95   :  { %1855 = vmatprep.subr.mxu1 %v743_v16 }
  0x96   :  { %2247 = vmatmul.mubr.f32.gmra.mxu0 %v82_v11  ;;  %v746_v11 = vld [vmem:[%s3858_s4 + $0x210] sm:$0xff] }
  0x97   :  { %2249 = vmatprep.mubr.f32.mxu0 %v83_v12  ;;  %1962 = vmatpush3.msra.mxu0 %v746_v11  ;;  %v761_v12 = vld [vmem:[%s3858_s4 + $0x288] sm:$0xff] }
  0x98   :  { %1963 = vmatprep.subr.mxu0 %v761_v12 }
  0x9a   :  { %2250 = vmatmul.mubr.f32.gmra.mxu0 %v84_v13  ;;  %v745_v13 = vld [vmem:[%s3858_s4 + $0x208] sm:$0xff] }
  0x9b   :  { %2252 = vmatprep.mubr.f32.mxu0 %v85_v14  ;;  %1964 = vmatpush3.msra.mxu0 %v745_v13  ;;  %v760_v14 = vld [vmem:[%s3858_s4 + $0x280] sm:$0xff] }
  0x9c   :  { %1965 = vmatprep.subr.mxu0 %v760_v14 }
  0x9e   :  { %2253 = vmatmul.mubr.f32.gmra.mxu0 %v86_v15  ;;  %v744_v15 = vld [vmem:[%s3858_s4 + $0x200] sm:$0xff] }
  0x9f   :  { %1966 = vmatpush3.msra.mxu0 %v744_v15 }
  0xa0   :  { %2255 = vmatprep.subr.mxu0 %v2852_v32 }
  0xe2   :  { %v2816_v17 = vpop.f32.mrf.mxu0 }
  0xe4   :  { %v2818_v18 = vpop.f32.mrf.mxu0 }
  0xe6   :  { %v2820_v19 = vpop.f32.mrf.mxu0 }
  0xe8   :  { %v2822_v20 = vpop.f32.mrf.mxu0 }
  0xea   :  { %v2824_v21 = vpop.f32.mrf.mxu0 }
  0xec   :  { %v2831_v23 = vpop.f32.mrf.mxu0 }
  0xee   :  { %v2833_v24 = vpop.f32.mrf.mxu0 }
  0xf0   :  { %v2835_v25 = vpop.f32.mrf.mxu0 }
  0xf2   :  { %v2837_v26 = vpop.f32.mrf.mxu0 }
  0xf4   :  { %v2839_v27 = vpop.f32.mrf.mxu0 }
  0xf6   :  { %v2841_v28 = vpop.f32.mrf.mxu0 }
  0xf8   :  { %v2843_v29 = vpop.f32.mrf.mxu0 }
  0xfa   :  { %v2845_v30 = vpop.f32.mrf.mxu0 }
  0xfc   :  { %v2847_v31 = vpop.f32.mrf.mxu0 }
  0xfe   :  { %v2854_v33 = vpop.f32.mrf.mxu0 }
 0x100   :  { %v2857_v34 = vpop.f32.mrf.mxu0 }
 0x102   :  { %v2185_v35 = vpop.f32.mrf.mxu0 }
 0x103   :  { %v489_v36 = vmax.f32 %v2816_v17, %v2185_v35 }
 0x104   :  { %v249_v37 = vpop.f32.mrf.mxu0 }
 0x105   :  { %v488_v38 = vmax.f32 %v2818_v18, %v249_v37  ;;  %v2935_v37 = vld [vmem:[%s3859_s2] ss:$0 sm:$0xff] }
 0x106   :  { %v2188_v39 = vpop.f32.mrf.mxu0 }
 0x107   :  { %v491_v40 = vmax.f32 %v2820_v19, %v2188_v39 }
 0x108   :  { %v2862_v41 = vpop.f32.mrf.mxu0 }
 0x109   :  { %v490_v42 = vmax.f32 %v2822_v20, %v2862_v41 }
 0x10a   :  { %v2866_v43 = vpop.f32.mrf.mxu0 }
 0x10b   :  { %v493_v44 = vmax.f32 %v2824_v21, %v2866_v43  ;;  %v580_v21 = vld [vmem:[%s3860_s3 + $0x28] sm:$0xff] }
 0x10c   :  { %v2870_v45 = vpop.f32.mrf.mxu0 }
 0x10d   :  { %v492_v46 = vmax.f32 %v2831_v23, %v2870_v45 }
 0x10e   :  { %v2874_v47 = vpop.f32.mrf.mxu0 }
 0x10f   :  { %v495_v48 = vmax.f32 %v2833_v24, %v2874_v47 }
 0x110   :  { %v2878_v49 = vpop.f32.mrf.mxu0 }
 0x112   :  { %v2882_v51 = vpop.f32.mrf.mxu0 }
 0x114   :  { %v2886_v53 = vpop.f32.mrf.mxu0 }
 0x116   :  { %v2890_v55 = vpop.f32.mrf.mxu0 }
 0x118   :  { %v2894_v57 = vpop.f32.mrf.mxu0 }
 0x11a   :  { %v2898_v59 = vpop.f32.mrf.mxu0 }
 0x11c   :  { %v2902_v61 = vpop.f32.mrf.mxu0 }
 0x11e   :  { %v2906_v63 = vpop.f32.mrf.mxu0 }
 0x120   :  { %v2910_v1 = vpop.f32.mrf.mxu0 }
 0x122   :  { %v2209_v3 = vpop.f32.mrf.mxu0 }
 0x124   :  { %v329_v4 = vpop.f32.mrf.mxu0 }
 0x126   :  { %v2212_v5 = vpop.f32.mrf.mxu0 }
 0x128   :  { %v339_v6 = vpop.f32.mrf.mxu0 }
 0x12a   :  { %v2215_v7 = vpop.f32.mrf.mxu0 }
 0x12c   :  { %v349_v8 = vpop.f32.mrf.mxu0 }
 0x12e   :  { %v2218_v9 = vpop.f32.mrf.mxu0 }
 0x130   :  { %v2914_v10 = vpop.f32.mrf.mxu0 }
 0x132   :  { %v2916_v11 = vpop.f32.mrf.mxu0 }
 0x134   :  { %v2918_v12 = vpop.f32.mrf.mxu0 }
 0x136   :  { %v2920_v13 = vpop.f32.mrf.mxu0 }
 0x138   :  { %v2922_v14 = vpop.f32.mrf.mxu0 }
 0x13a   :  { %v2924_v15 = vpop.f32.mrf.mxu0 }
 0x13c   :  { %v2926_v16 = vpop.f32.mrf.mxu0 }
 0x13e   :  { %v2928_v17 = vpop.f32.mrf.mxu0 }
 0x140   :  { %v2930_v18 = vpop.f32.mrf.mxu0 }
 0x142   :  { %v2233_v19 = vpop.f32.mrf.mxu0 }
 0x143   :  { %v505_v35 = vmax.f32 %v2209_v3, %v2233_v19 }
 0x144   :  { %v409_v39 = vpop.f32.mrf.mxu0 }
 0x145   :  { %v521_v22 = vmax.f32 %v489_v36, %v505_v35  ;;  %v504_v2 = vmax.f32 %v329_v4, %v409_v39  ;;  %v575_v36 = vld [vmem:[%s3860_s3] sm:$0xff] }
 0x146   :  { %v2236_v0 = vpop.f32.mrf.mxu0 }
 0x147   :  { %v544_v62 = vadd.f32 %v2935_v37, %v521_v22  ;;  %v520_v60 = vmax.f32 %v488_v38, %v504_v2  ;;  %v507_v58 = vmax.f32 %v2212_v5, %v2236_v0  ;;  %v577_v2 = vld [vmem:[%s3860_s3 + $0x10] sm:$0xff] }
 0x148   :  { %v419_v54 = vpop.f32.mrf.mxu0 }
 0x149   :  { %v560_v52 = vmax.f32 %v544_v62, 0.0  ;;  %v543_v3 = vadd.f32 %v2935_v37, %v520_v60  ;;  %v523_v19 = vmax.f32 %v491_v40, %v507_v58  ;;  %v506_v50 = vmax.f32 %v339_v6, %v419_v54  ;;  %v578_v60 = vld [vmem:[%s3860_s3 + $0x18] sm:$0xff] }
 0x14a   :  { %v2239_v4 = vpop.f32.mrf.mxu0 }
 0x14b   :  { %v2945_v35 = vadd.f32 %v576_v56, %v560_v52  ;;  %v559_v22 = vmax.f32 %v543_v3, 0.0  ;;  %v546_v38 = vadd.f32 %v2935_v37, %v523_v19  ;;  %v522_v0 = vmax.f32 %v490_v42, %v506_v50 }
 0x14c   :  { %v509_v40 = vmax.f32 %v2215_v7, %v2239_v4  ;;  %v429_v54 = vpop.f32.mrf.mxu0 }
 0x14d   :  { %608 = vst [vmem:[#allocation2 + $0x8] sm:$0xff] %v2945_v35  ;;  %v591_v58 = vadd.f32 %v575_v36, %v559_v22  ;;  %v562_v62 = vmax.f32 %v546_v38, 0.0  ;;  %v545_v52 = vadd.f32 %v2935_v37, %v522_v0  ;;  %v508_v56 = vmax.f32 %v349_v8, %v429_v54 }
 0x14e   :  { %v525_v20 = vmax.f32 %v493_v44, %v509_v40  ;;  %v2242_v41 = vpop.f32.mrf.mxu0  ;;  %v3867_v36 = vmax.f32 %v2835_v25, %v2878_v49  ;;  %v581_v25 = vld [vmem:[%s3860_s3 + $0x30] sm:$0xff] }
 0x14f   :  { %607 = vst [vmem:[#allocation2] sm:$0xff] %v591_v58  ;;  %v2962_v42 = vadd.f32 %v578_v60, %v562_v62  ;;  %v561_v50 = vmax.f32 %v545_v52, 0.0  ;;  %v524_v5 = vmax.f32 %v492_v46, %v508_v56  ;;  %v511_v6 = vmax.f32 %v2218_v9, %v2242_v41  ;;  %v579_v46 = vld [vmem:[%s3860_s3 + $0x20] sm:$0xff]  ;;  %v727_v62 = vld [vmem:[%s3858_s4 + $0x178] sm:$0xff] }
 0x150   :  { %v548_v7 = vadd.f32 %v2935_v37, %v525_v20  ;;  %v439_v8 = vpop.f32.mrf.mxu0  ;;  %v3868_v60 = vmax.f32 %v2837_v26, %v2882_v51  ;;  %v3869_v20 = vmax.f32 %v2839_v27, %v2886_v53  ;;  %v726_v53 = vld [vmem:[%s3858_s4 + $0x170] sm:$0xff] }
 0x151   :  { %610 = vst [vmem:[#allocation2 + $0x18] sm:$0xff] %v2962_v42  ;;  %v2969_v39 = vadd.f32 %v577_v2, %v561_v50  ;;  %v547_v43 = vadd.f32 %v2935_v37, %v524_v5  ;;  %v527_v44 = vmax.f32 %v495_v48, %v511_v6  ;;  %v510_v23 = vmax.f32 %v2914_v10, %v439_v8  ;;  %v582_v48 = vld [vmem:[%s3860_s3 + $0x38] sm:$0xff]  ;;  %v584_v2 = vld [vmem:[%s3860_s3 + $0x48] sm:$0xff] }
 0x152   :  { %v564_v45 = vmax.f32 %v548_v7, 0.0  ;;  %v2245_v9 = vpop.f32.mrf.mxu0  ;;  %v3870_v6 = vmax.f32 %v2841_v28, %v2890_v55  ;;  %v583_v28 = vld [vmem:[%s3860_s3 + $0x40] sm:$0xff] }
 0x153   :  { %609 = vst [vmem:[#allocation2 + $0x10] sm:$0xff] %v2969_v39  ;;  %v563_v3 = vmax.f32 %v547_v43, 0.0  ;;  %v550_v19 = vadd.f32 %v2935_v37, %v527_v44  ;;  %v526_v4 = vmax.f32 %v3867_v36, %v510_v23  ;;  %v513_v24 = vmax.f32 %v2916_v11, %v2245_v9  ;;  %v586_v9 = vld [vmem:[%s3860_s3 + $0x58] sm:$0xff] }
 0x154   :  { %v2988_v47 = vadd.f32 %v580_v21, %v564_v45  ;;  %v449_v10 = vpop.f32.mrf.mxu0 }
 0x155   :  { %v2993_v22 = vadd.f32 %v579_v46, %v563_v3  ;;  %v566_v38 = vmax.f32 %v550_v19, 0.0  ;;  %v549_v0 = vadd.f32 %v2935_v37, %v526_v4  ;;  %v529_v40 = vmax.f32 %v3868_v60, %v513_v24  ;;  %v741_v19 = vld [vmem:[%s3858_s4 + $0x1e8] sm:$0xff] }
 0x156   :  { %612 = vst [vmem:[#allocation2 + $0x28] sm:$0xff] %v2988_v47  ;;  %v512_v49 = vmax.f32 %v2918_v12, %v449_v10  ;;  %v2248_v11 = vpop.f32.mrf.mxu0  ;;  %v642_v54 = vld [vmem:[#allocation2 + $0x1] sm:$0xff]  ;;  %v742_v12 = vld [vmem:[%s3858_s4 + $0x1f0] sm:$0xff] }
 0x157   :  { %611 = vst [vmem:[#allocation2 + $0x20] sm:$0xff] %v2993_v22  ;;  %v3008_v52 = vadd.f32 %v582_v48, %v566_v38  ;;  %v565_v26 = vmax.f32 %v549_v0, 0.0  ;;  %v552_v51 = vadd.f32 %v2935_v37, %v529_v40  ;;  %v515_v56 = vmax.f32 %v2920_v13, %v2248_v11  ;;  %888 = vmatprep.mubr.f32.mxu1 %v642_v54  ;;  %v3066_v10 = vld [vmem:[%s3858_s4 + $0x470] sm:$0xff]  ;;  %v588_v11 = vld [vmem:[%s3860_s3 + $0x68] sm:$0xff] }
 0x158   :  { %v528_v41 = vmax.f32 %v3869_v20, %v512_v49  ;;  %v459_v50 = vpop.f32.mrf.mxu0  ;;  %889 = vmatmul.mubr.f32.vlgmr.msra.gmra.mxu1 %v591_v58  ;;  %v587_v20 = vld [vmem:[%s3860_s3 + $0x60] sm:$0xff] }
 0x159   :  { %614 = vst [vmem:[#allocation2 + $0x38] sm:$0xff] %v3008_v52  ;;  %v3022_v5 = vadd.f32 %v581_v25, %v565_v26  ;;  %v568_v13 = vmax.f32 %v552_v51, 0.0  ;;  %v531_v7 = vmax.f32 %v3870_v6, %v515_v56  ;;  %v514_v8 = vmax.f32 %v2922_v14, %v459_v50  ;;  %1856 = vmatpush3.msra.mxu1 %v727_v62  ;;  %v740_v26 = vld [vmem:[%s3858_s4 + $0x1e0] sm:$0xff] }
 0x15a   :  { %v551_v21 = vadd.f32 %v2935_v37, %v528_v41  ;;  %v2251_v43 = vpop.f32.mrf.mxu0  ;;  %v643_v44 = vld [vmem:[#allocation2 + $0x9] sm:$0xff]  ;;  %1857 = vmatprep.subr.mxu1 %v742_v12  ;;  %v3871_v14 = vmax.f32 %v2843_v29, %v2894_v57  ;;  %v3059_v24 = vld [vmem:[#allocation2 + $0x11] sm:$0xff]  ;;  %v3873_v25 = vmax.f32 %v2847_v31, %v2902_v61  ;;  %v3874_v41 = vmax.f32 %v2854_v33, %v2906_v63  ;;  %v724_v50 = vld [vmem:[%s3858_s4 + $0x160] sm:$0xff] }
 0x15b   :  { %v3029_v27 = vld [vmem:[#allocation2 + $0xa] sm:$0xff]  ;;  %613 = vst [vmem:[#allocation2 + $0x30] sm:$0xff] %v3022_v5  ;;  %v3035_v58 = vadd.f32 %v584_v2, %v568_v13  ;;  %v554_v55 = vadd.f32 %v2935_v37, %v531_v7  ;;  %v517_v45 = vmax.f32 %v2924_v15, %v2251_v43  ;;  %893 = vmatprep.mubr.f32.mxu1 %v643_v44  ;;  %v3061_v48 = vld [vmem:[#allocation2 + $0x12] sm:$0xff] }
 0x15c   :  { %v530_v23 = vmax.f32 %v3871_v14, %v514_v8  ;;  %v567_v46 = vmax.f32 %v551_v21, 0.0  ;;  %1178 = vmatprep.mubr.f32.mxu0 %v3029_v27  ;;  %v469_v3 = vpop.f32.mrf.mxu0  ;;  %894 = vmatmul.mubr.f32.gmra.mxu1 %v2945_v35  ;;  %v3872_v15 = vmax.f32 %v2845_v30, %v2898_v59  ;;  %v585_v30 = vld [vmem:[%s3860_s3 + $0x50] sm:$0xff]  ;;  %v3108_v2 = vld [vmem:[%s3858_s4 + $0x468] sm:$0xff]  ;;  %v3875_v7 = vmax.f32 %v2857_v34, %v2910_v1  ;;  %v590_v63 = vld [vmem:[%s3860_s3 + $0x78] sm:$0xff] }
 0x15d   :  { %616 = vst [vmem:[#allocation2 + $0x48] sm:$0xff] %v3035_v58  ;;  %v570_v29 = vmax.f32 %v554_v55, 0.0  ;;  %v516_v4 = vmax.f32 %v2926_v16, %v469_v3  ;;  %1858 = vmatpush3.msra.mxu1 %v726_v53  ;;  %1179 = vmatmul.mubr.f32.vlgmr.msra.gmra.mxu0 %v643_v44  ;;  %v725_v16 = vld [vmem:[%s3858_s4 + $0x168] sm:$0xff]  ;;  %v739_v21 = vld [vmem:[%s3858_s4 + $0x1d8] sm:$0xff]  ;;  %v3149_v53 = vld [vmem:[%s3858_s4 + $0x460] sm:$0xff] }
 0x15e   :  { %v553_v57 = vadd.f32 %v2935_v37, %v530_v23  ;;  %v533_v36 = vmax.f32 %v3872_v15, %v517_v45  ;;  %v3068_v38 = vadd.f32 %v583_v28, %v567_v46  ;;  %898 = vmatprep.mubr.f32.mxu1 %v3059_v24  ;;  %1183 = vmatprep.mubr.f32.mxu0 %v3061_v48  ;;  %v2254_v59 = vpop.f32.mrf.mxu0  ;;  %v3103_v12 = vld [vmem:[#allocation2 + $0x1a] sm:$0xff]  ;;  %v3144_v44 = vld [vmem:[#allocation2 + $0x22] sm:$0xff]  ;;  %v589_v55 = vld [vmem:[%s3860_s3 + $0x70] sm:$0xff] }
 0x15f   :  { %v3078_v0 = vadd.f32 %v586_v9, %v570_v29  ;;  %v532_v49 = vmax.f32 %v3873_v25, %v516_v4  ;;  %1859 = vmatprep.subr.mxu1 %v741_v19  ;;  %2256 = vmatpush3.msra.mxu0 %v2852_v32  ;;  %v519_v54 = vmax.f32 %v2928_v17, %v2254_v59  ;;  %v3101_v17 = vld [vmem:[#allocation2 + $0x19] sm:$0xff]  ;;  %v3142_v43 = vld [vmem:[#allocation2 + $0x21] sm:$0xff]  ;;  %v738_v45 = vld [vmem:[%s3858_s4 + $0x1d0] sm:$0xff] }
 0x160   :  { %v569_v60 = vmax.f32 %v553_v57, 0.0  ;;  %v556_v40 = vadd.f32 %v2935_v37, %v533_v36  ;;  %615 = vst [vmem:[#allocation2 + $0x40] sm:$0xff] %v3068_v38  ;;  %v479_v62 = vpop.f32.mrf.mxu0  ;;  %899 = vmatmul.mubr.f32.gmra.mxu1 %v2969_v39  ;;  %2257 = vmatprep.subr.mxu0 %v3066_v10  ;;  %v3178_v19 = vld [vmem:[%s3858_s4 + $0x458] sm:$0xff]  ;;  %v722_v29 = vld [vmem:[%s3858_s4 + $0x150] sm:$0xff]  ;;  %v737_v57 = vld [vmem:[%s3858_s4 + $0x1c8] sm:$0xff] }
 0x161   :  { %618 = vst [vmem:[#allocation2 + $0x58] sm:$0xff] %v3078_v0  ;;  %v555_v51 = vadd.f32 %v2935_v37, %v532_v49  ;;  %v518_v56 = vmax.f32 %v2930_v18, %v479_v62  ;;  %1860 = vmatpush3.msra.mxu1 %v725_v16  ;;  %1184 = vmatmul.mubr.f32.gmra.mxu0 %v3059_v24  ;;  %v3201_v4 = vld [vmem:[%s3858_s4 + $0x450] sm:$0xff]  ;;  %v736_v59 = vld [vmem:[%s3858_s4 + $0x1c0] sm:$0xff]  ;;  %v735_v49 = vld [vmem:[%s3858_s4 + $0x1b8] sm:$0xff] }
 0x162   :  { %v3096_v31 = vadd.f32 %v585_v30, %v569_v60  ;;  %v572_v61 = vmax.f32 %v556_v40, 0.0  ;;  %v535_v18 = vmax.f32 %v3874_v41, %v519_v54  ;;  %903 = vmatprep.mubr.f32.mxu1 %v3101_v17  ;;  %1188 = vmatprep.mubr.f32.mxu0 %v3103_v12  ;;  %v3171_v9 = vld [vmem:[#allocation2 + $0x29] sm:$0xff]  ;;  %v3194_v15 = vld [vmem:[#allocation2 + $0x31] sm:$0xff]  ;;  %v720_v25 = vld [vmem:[%s3858_s4 + $0x140] sm:$0xff] }
 0x163   :  { %v571_v6 = vmax.f32 %v555_v51, 0.0  ;;  %v534_v8 = vmax.f32 %v3875_v7, %v518_v56  ;;  %1861 = vmatprep.subr.mxu1 %v740_v26  ;;  %2258 = vmatpush3.msra.mxu0 %v3066_v10  ;;  %v3173_v3 = vld [vmem:[#allocation2 + $0x2a] sm:$0xff]  ;;  %v3196_v36 = vld [vmem:[#allocation2 + $0x32] sm:$0xff]  ;;  %v3243_v62 = vld [vmem:[%s3858_s4 + $0x440] sm:$0xff] }
 0x164   :  { %617 = vst [vmem:[#allocation2 + $0x50] sm:$0xff] %v3096_v31  ;;  %v3122_v13 = vadd.f32 %v588_v11, %v572_v61  ;;  %v558_v33 = vadd.f32 %v2935_v37, %v535_v18  ;;  %904 = vmatmul.mubr.f32.gmra.mxu1 %v2962_v42  ;;  %2259 = vmatprep.subr.mxu0 %v3108_v2  ;;  %v721_v30 = vld [vmem:[%s3858_s4 + $0x148] sm:$0xff]  ;;  %v719_v26 = vld [vmem:[%s3858_s4 + $0x138] sm:$0xff]  ;;  %v734_v61 = vld [vmem:[%s3858_s4 + $0x1b0] sm:$0xff] }
 0x165   :  { %v3138_v34 = vadd.f32 %v587_v20, %v571_v6  ;;  %v557_v1 = vadd.f32 %v2935_v37, %v534_v8  ;;  %1862 = vmatpush3.msra.mxu1 %v724_v50  ;;  %1189 = vmatmul.mubr.f32.gmra.mxu0 %v3101_v17  ;;  %v723_v37 = vld [vmem:[%s3858_s4 + $0x158] sm:$0xff]  ;;  %v3222_v40 = vld [vmem:[%s3858_s4 + $0x448] sm:$0xff]  ;;  %v718_v41 = vld [vmem:[%s3858_s4 + $0x130] sm:$0xff] }
 0x166   :  { %620 = vst [vmem:[#allocation2 + $0x68] sm:$0xff] %v3122_v13  ;;  %v574_v28 = vmax.f32 %v558_v33, 0.0  ;;  %908 = vmatprep.mubr.f32.mxu1 %v3142_v43  ;;  %1193 = vmatprep.mubr.f32.mxu0 %v3144_v44  ;;  %v3264_v20 = vld [vmem:[%s3858_s4 + $0x438] sm:$0xff]  ;;  %v733_v18 = vld [vmem:[%s3858_s4 + $0x1a8] sm:$0xff]  ;;  %v3285_v7 = vld [vmem:[%s3858_s4 + $0x430] sm:$0xff] }
 0x167   :  { %619 = vst [vmem:[#allocation2 + $0x60] sm:$0xff] %v3138_v34  ;;  %v573_v14 = vmax.f32 %v557_v1, 0.0  ;;  %1863 = vmatprep.subr.mxu1 %v739_v21  ;;  %2260 = vmatpush3.msra.mxu0 %v3108_v2  ;;  %v3215_v16 = vld [vmem:[#allocation2 + $0x39] sm:$0xff]  ;;  %v3236_v11 = vld [vmem:[#allocation2 + $0x41] sm:$0xff] }
 0x168   :  { %v3161_v23 = vadd.f32 %v590_v63, %v574_v28  ;;  %909 = vmatmul.mubr.f32.gmra.mxu1 %v2993_v22  ;;  %2261 = vmatprep.subr.mxu0 %v3149_v53  ;;  %v3217_v60 = vld [vmem:[#allocation2 + $0x3a] sm:$0xff]  ;;  %v3238_v54 = vld [vmem:[#allocation2 + $0x42] sm:$0xff] }
 0x169   :  { %v3168_v46 = vadd.f32 %v589_v55, %v573_v14  ;;  %1864 = vmatpush3.msra.mxu1 %v723_v37  ;;  %1194 = vmatmul.mubr.f32.gmra.mxu0 %v3142_v43  ;;  %v717_v8 = vld [vmem:[%s3858_s4 + $0x128] sm:$0xff]  ;;  %v732_v33 = vld [vmem:[%s3858_s4 + $0x1a0] sm:$0xff]  ;;  %v731_v55 = vld [vmem:[%s3858_s4 + $0x198] sm:$0xff] }
 0x16a   :  { %622 = vst [vmem:[#allocation2 + $0x78] sm:$0xff] %v3161_v23  ;;  %913 = vmatprep.mubr.f32.mxu1 %v3171_v9  ;;  %1198 = vmatprep.mubr.f32.mxu0 %v3173_v3  ;;  %v3306_v1 = vld [vmem:[%s3858_s4 + $0x428] sm:$0xff]  ;;  %v716_v28 = vld [vmem:[%s3858_s4 + $0x120] sm:$0xff] }
 0x16b   :  { %621 = vst [vmem:[#allocation2 + $0x70] sm:$0xff] %v3168_v46  ;;  %1865 = vmatprep.subr.mxu1 %v738_v45  ;;  %2262 = vmatpush3.msra.mxu0 %v3149_v53  ;;  %v3257_v51 = vld [vmem:[#allocation2 + $0x49] sm:$0xff]  ;;  %v3278_v50 = vld [vmem:[#allocation2 + $0x51] sm:$0xff]  ;;  %v3327_v45 = vld [vmem:[%s3858_s4 + $0x420] sm:$0xff] }
 0x16c   :  { %914 = vmatmul.mubr.f32.gmra.mxu1 %v2988_v47  ;;  %2263 = vmatprep.subr.mxu0 %v3178_v19  ;;  %v3259_v56 = vld [vmem:[#allocation2 + $0x4a] sm:$0xff]  ;;  %v3280_v6 = vld [vmem:[#allocation2 + $0x52] sm:$0xff] }
 0x16d   :  { %1866 = vmatpush3.msra.mxu1 %v722_v29  ;;  %1199 = vmatmul.mubr.f32.gmra.mxu0 %v3171_v9  ;;  %v715_v29 = vld [vmem:[%s3858_s4 + $0x118] sm:$0xff] }
 0x16e   :  { %918 = vmatprep.mubr.f32.mxu1 %v3194_v15  ;;  %1203 = vmatprep.mubr.f32.mxu0 %v3196_v36  ;;  %v3299_v63 = vld [vmem:[#allocation2 + $0x59] sm:$0xff]  ;;  %v3320_v37 = vld [vmem:[#allocation2 + $0x61] sm:$0xff] }
 0x16f   :  { %1867 = vmatprep.subr.mxu1 %v737_v57  ;;  %2264 = vmatpush3.msra.mxu0 %v3178_v19  ;;  %v3301_v21 = vld [vmem:[#allocation2 + $0x5a] sm:$0xff]  ;;  %v3322_v14 = vld [vmem:[#allocation2 + $0x62] sm:$0xff]  ;;  %v730_v57 = vld [vmem:[%s3858_s4 + $0x190] sm:$0xff] }
 0x170   :  { %919 = vmatmul.mubr.f32.gmra.mxu1 %v3022_v5  ;;  %2265 = vmatprep.subr.mxu0 %v3201_v4 }
 0x171   :  { %1868 = vmatpush3.msra.mxu1 %v721_v30  ;;  %1204 = vmatmul.mubr.f32.gmra.mxu0 %v3194_v15 }
 0x172   :  { %923 = vmatprep.mubr.f32.mxu1 %v3215_v16  ;;  %1208 = vmatprep.mubr.f32.mxu0 %v3217_v60  ;;  %v3341_v30 = vld [vmem:[#allocation2 + $0x69] sm:$0xff] }
 0x173   :  { %1869 = vmatprep.subr.mxu1 %v736_v59  ;;  %2266 = vmatpush3.msra.mxu0 %v3201_v4  ;;  %3876 = vst [vmem:[#allocation4_spill] sm:$0xff] %v3341_v30  ;;  %v3343_v59 = vld [vmem:[#allocation2 + $0x6a] sm:$0xff] }
 0x174   :  { %924 = vmatmul.mubr.f32.gmra.mxu1 %v3008_v52  ;;  %2267 = vmatprep.subr.mxu0 %v3222_v40 }
 0x175   :  { %1870 = vmatpush3.msra.mxu1 %v720_v25  ;;  %1209 = vmatmul.mubr.f32.gmra.mxu0 %v3215_v16  ;;  %v3348_v25 = vld [vmem:[%s3858_s4 + $0x418] sm:$0xff] }
 0x176   :  { %928 = vmatprep.mubr.f32.mxu1 %v3236_v11  ;;  %1213 = vmatprep.mubr.f32.mxu0 %v3238_v54 }
 0x177   :  { %1871 = vmatprep.subr.mxu1 %v735_v49  ;;  %2268 = vmatpush3.msra.mxu0 %v3222_v40  ;;  %v714_v49 = vld [vmem:[%s3858_s4 + $0x110] sm:$0xff] }
 0x178   :  { %929 = vmatmul.mubr.f32.gmra.mxu1 %v3068_v38  ;;  %2269 = vmatprep.subr.mxu0 %v3243_v62 }
 0x179   :  { %1872 = vmatpush3.msra.mxu1 %v719_v26  ;;  %1214 = vmatmul.mubr.f32.gmra.mxu0 %v3236_v11  ;;  %v729_v26 = vld [vmem:[%s3858_s4 + $0x188] sm:$0xff] }
 0x17a   :  { %933 = vmatprep.mubr.f32.mxu1 %v3257_v51  ;;  %1218 = vmatprep.mubr.f32.mxu0 %v3259_v56 }
 0x17b   :  { %1873 = vmatprep.subr.mxu1 %v734_v61  ;;  %2270 = vmatpush3.msra.mxu0 %v3243_v62  ;;  %v3362_v61 = vld [vmem:[#allocation2 + $0x71] sm:$0xff] }
 0x17c   :  { %934 = vmatmul.mubr.f32.gmra.mxu1 %v3035_v58  ;;  %2271 = vmatprep.subr.mxu0 %v3264_v20  ;;  %3877 = vst [vmem:[#allocation5_spill] sm:$0xff] %v3362_v61 }
 0x17d   :  { %1874 = vmatpush3.msra.mxu1 %v718_v41  ;;  %1219 = vmatmul.mubr.f32.gmra.mxu0 %v3257_v51  ;;  %v3364_v41 = vld [vmem:[#allocation2 + $0x72] sm:$0xff] }
 0x17e   :  { %938 = vmatprep.mubr.f32.mxu1 %v3278_v50  ;;  %1223 = vmatprep.mubr.f32.mxu0 %v3280_v6 }
 0x17f   :  { %1875 = vmatprep.subr.mxu1 %v733_v18  ;;  %2272 = vmatpush3.msra.mxu0 %v3264_v20  ;;  %v3369_v18 = vld [vmem:[%s3858_s4 + $0x410] sm:$0xff] }
 0x180   :  { %939 = vmatmul.mubr.f32.gmra.mxu1 %v3096_v31  ;;  %2273 = vmatprep.subr.mxu0 %v3285_v7 }
 0x181   :  { %1876 = vmatpush3.msra.mxu1 %v717_v8  ;;  %1224 = vmatmul.mubr.f32.gmra.mxu0 %v3278_v50  ;;  %v713_v8 = vld [vmem:[%s3858_s4 + $0x108] sm:$0xff] }
 0x182   :  { %943 = vmatprep.mubr.f32.mxu1 %v3299_v63  ;;  %1228 = vmatprep.mubr.f32.mxu0 %v3301_v21 }
 0x183   :  { %1877 = vmatprep.subr.mxu1 %v732_v33  ;;  %2274 = vmatpush3.msra.mxu0 %v3285_v7  ;;  %v728_v33 = vld [vmem:[%s3858_s4 + $0x180] sm:$0xff] }
 0x184   :  { %944 = vmatmul.mubr.f32.gmra.mxu1 %v3078_v0  ;;  %2275 = vmatprep.subr.mxu0 %v3306_v1 }
 0x185   :  { %1878 = vmatpush3.msra.mxu1 %v716_v28  ;;  %1229 = vmatmul.mubr.f32.gmra.mxu0 %v3299_v63  ;;  %v3383_v28 = vld [vmem:[#allocation2 + $0x79] sm:$0xff] }
 0x186   :  { %948 = vmatprep.mubr.f32.mxu1 %v3320_v37  ;;  %1233 = vmatprep.mubr.f32.mxu0 %v3322_v14 }
 0x187   :  { %1879 = vmatprep.subr.mxu1 %v731_v55  ;;  %2276 = vmatpush3.msra.mxu0 %v3306_v1  ;;  %v3385_v55 = vld [vmem:[#allocation2 + $0x7a] sm:$0xff] }
 0x188   :  { %949 = vmatmul.mubr.f32.gmra.mxu1 %v3138_v34  ;;  %2277 = vmatprep.subr.mxu0 %v3327_v45 }
 0x189   :  { %1880 = vmatpush3.msra.mxu1 %v715_v29  ;;  %1234 = vmatmul.mubr.f32.gmra.mxu0 %v3320_v37  ;;  %v3390_v29 = vld [vmem:[%s3858_s4 + $0x408] sm:$0xff] }
 0x18a   :  { %953 = vmatprep.mubr.f32.mxu1 %v3341_v30  ;;  %1238 = vmatprep.mubr.f32.mxu0 %v3343_v59 }
 0x18b   :  { %1881 = vmatprep.subr.mxu1 %v730_v57  ;;  %2278 = vmatpush3.msra.mxu0 %v3327_v45  ;;  %v712_v57 = vld [vmem:[%s3858_s4 + $0x100] sm:$0xff] }
 0x18c   :  { %954 = vmatmul.mubr.f32.gmra.mxu1 %v3122_v13  ;;  %2279 = vmatprep.subr.mxu0 %v3348_v25 }
 0x18d   :  { %1882 = vmatpush3.msra.mxu1 %v714_v49  ;;  %1239 = vmatmul.mubr.f32.gmra.mxu0 %v3341_v30  ;;  %v3397_v49 = vld [vmem:[#allocation2 + $0x82] sm:$0xff] }
 0x18e   :  { %958 = vmatprep.mubr.f32.mxu1 %v3362_v61  ;;  %1243 = vmatprep.mubr.f32.mxu0 %v3364_v41  ;;  %v658_v30 = vld [vmem:[#allocation2 + $0x2] sm:$0xff] }
 0x18f   :  { %1883 = vmatprep.subr.mxu1 %v729_v26  ;;  %2280 = vmatpush3.msra.mxu0 %v3348_v25  ;;  %v807_v26 = vld [vmem:[%s3858_s4 + $0x3f8] sm:$0xff] }
 0x190   :  { %959 = vmatmul.mubr.f32.gmra.mxu1 %v3168_v46  ;;  %2281 = vmatprep.subr.mxu0 %v3369_v18 }
 0x191   :  { %1884 = vmatpush3.msra.mxu1 %v713_v8  ;;  %1244 = vmatmul.mubr.f32.gmra.mxu0 %v3362_v61  ;;  %v3409_v8 = vld [vmem:[%s3858_s4 + $0x400] sm:$0xff]  ;;  %v791_v61 = vld [vmem:[%s3858_s4 + $0x378] sm:$0xff] }
 0x192   :  { %963 = vmatprep.mubr.f32.mxu1 %v3383_v28  ;;  %1248 = vmatprep.mubr.f32.mxu0 %v3385_v55 }
 0x193   :  { %1885 = vmatprep.subr.mxu1 %v728_v33  ;;  %2282 = vmatpush3.msra.mxu0 %v3369_v18  ;;  %v3413_v33 = vld [vmem:[#allocation2 + $0x81] sm:$0xff] }
 0x194   :  { %964 = vmatmul.mubr.f32.gmra.mxu1 %v3161_v23  ;;  %2283 = vmatprep.subr.mxu0 %v3390_v29 }
 0x195   :  { %1886 = vmatpush3.msra.mxu1 %v712_v57  ;;  %1249 = vmatmul.mubr.f32.gmra.mxu0 %v3383_v28  ;;  %v806_v57 = vld [vmem:[%s3858_s4 + $0x3f0] sm:$0xff] }
 0x196   :  { %1033 = vmatprep.mubr.f32.mxu1 %v2945_v35  ;;  %1253 = vmatprep.mubr.f32.mxu0 %v3397_v49  ;;  %v790_v35 = vld [vmem:[%s3858_s4 + $0x370] sm:$0xff] }
 0x197   :  { %2015 = vmatprep.subr.mxu1 %v807_v26  ;;  %2284 = vmatpush3.msra.mxu0 %v3390_v29  ;;  %v788_v26 = vld [vmem:[%s3858_s4 + $0x360] sm:$0xff] }
 0x198   :  { %1034 = vmatmul.mubr.f32.vlgmr.msra.gmra.mxu1 %v658_v30  ;;  %2285 = vmatprep.subr.mxu0 %v3409_v8  ;;  %v805_v30 = vld [vmem:[%s3858_s4 + $0x3e8] sm:$0xff] }
 0x199   :  { %1254 = vmatmul.mubr.f32.gmra.mxu0 %v3413_v33  ;;  %2016 = vmatpush3.msra.mxu1 %v791_v61  ;;  %v789_v61 = vld [vmem:[%s3858_s4 + $0x368] sm:$0xff] }
 0x19a   :  { %1038 = vmatprep.mubr.f32.mxu1 %v2969_v39  ;;  %2287 = vmatprep.mubr.f32.mxu0 %v3061_v48 }
 0x19b   :  { %2017 = vmatprep.subr.mxu1 %v806_v57  ;;  %2286 = vmatpush3.msra.mxu0 %v3409_v8  ;;  %v787_v57 = vld [vmem:[%s3858_s4 + $0x358] sm:$0xff] }
 0x19c   :  { %1039 = vmatmul.mubr.f32.gmra.mxu1 %v3029_v27  ;;  %v804_v27 = vld [vmem:[%s3858_s4 + $0x3e0] sm:$0xff] }
 0x19d   :  { %2018 = vmatpush3.msra.mxu1 %v790_v35  ;;  %2288 = vmatmul.mubr.f32.vlgmr.msra.gmra.mxu0 %v3103_v12  ;;  %v786_v35 = vld [vmem:[%s3858_s4 + $0x350] sm:$0xff] }
 0x19e   :  { %1043 = vmatprep.mubr.f32.mxu1 %v2962_v42  ;;  %2290 = vmatprep.mubr.f32.mxu0 %v3144_v44 }
 0x19f   :  { %2019 = vmatprep.subr.mxu1 %v805_v30  ;;  %v801_v30 = vld [vmem:[%s3858_s4 + $0x3c8] sm:$0xff] }
 0x1a0   :  { %1044 = vmatmul.mubr.f32.gmra.mxu1 %v3061_v48  ;;  %v803_v48 = vld [vmem:[%s3858_s4 + $0x3d8] sm:$0xff] }
 0x1a1   :  { %2020 = vmatpush3.msra.mxu1 %v789_v61  ;;  %2291 = vmatmul.mubr.f32.gmra.mxu0 %v3173_v3  ;;  %v785_v61 = vld [vmem:[%s3858_s4 + $0x348] sm:$0xff] }
 0x1a2   :  { %1048 = vmatprep.mubr.f32.mxu1 %v2993_v22  ;;  %2293 = vmatprep.mubr.f32.mxu0 %v3196_v36 }
 0x1a3   :  { %2021 = vmatprep.subr.mxu1 %v804_v27  ;;  %v784_v27 = vld [vmem:[%s3858_s4 + $0x340] sm:$0xff] }
 0x1a4   :  { %1049 = vmatmul.mubr.f32.gmra.mxu1 %v3103_v12  ;;  %v802_v12 = vld [vmem:[%s3858_s4 + $0x3d0] sm:$0xff] }
 0x1a5   :  { %2022 = vmatpush3.msra.mxu1 %v788_v26  ;;  %2294 = vmatmul.mubr.f32.gmra.mxu0 %v3217_v60  ;;  %v799_v26 = vld [vmem:[%s3858_s4 + $0x3b8] sm:$0xff] }
 0x1a6   :  { %1053 = vmatprep.mubr.f32.mxu1 %v2988_v47  ;;  %2296 = vmatprep.mubr.f32.mxu0 %v3238_v54 }
 0x1a7   :  { %2023 = vmatprep.subr.mxu1 %v803_v48  ;;  %v783_v48 = vld [vmem:[%s3858_s4 + $0x338] sm:$0xff] }
 0x1a8   :  { %1054 = vmatmul.mubr.f32.gmra.mxu1 %v3144_v44  ;;  %v800_v44 = vld [vmem:[%s3858_s4 + $0x3c0] sm:$0xff] }
 0x1a9   :  { %2024 = vmatpush3.msra.mxu1 %v787_v57  ;;  %2297 = vmatmul.mubr.f32.gmra.mxu0 %v3259_v56  ;;  %v782_v57 = vld [vmem:[%s3858_s4 + $0x330] sm:$0xff] }
 0x1aa   :  { %1058 = vmatprep.mubr.f32.mxu1 %v3022_v5  ;;  %2025 = vmatprep.subr.mxu1 %v802_v12  ;;  %v797_v12 = vld [vmem:[%s3858_s4 + $0x3a8] sm:$0xff] }
 0x1ab   :  { %2026 = vmatpush3.msra.mxu1 %v786_v35  ;;  %v781_v35 = vld [vmem:[%s3858_s4 + $0x328] sm:$0xff] }
 0x1ac   :  { %1059 = vmatmul.mubr.f32.gmra.mxu1 %v3173_v3  ;;  %2027 = vmatprep.subr.mxu1 %v801_v30  ;;  %v798_v3 = vld [vmem:[%s3858_s4 + $0x3b0] sm:$0xff]  ;;  %v780_v30 = vld [vmem:[%s3858_s4 + $0x320] sm:$0xff] }
 0x1ad   :  { %1063 = vmatprep.mubr.f32.mxu1 %v3008_v52  ;;  %2028 = vmatpush3.msra.mxu1 %v785_v61  ;;  %v795_v61 = vld [vmem:[%s3858_s4 + $0x398] sm:$0xff] }
 0x1ae   :  { %2029 = vmatprep.subr.mxu1 %v800_v44  ;;  %v779_v44 = vld [vmem:[%s3858_s4 + $0x318] sm:$0xff] }
 0x1af   :  { %2030 = vmatpush3.msra.mxu1 %v784_v27  ;;  %v778_v27 = vld [vmem:[%s3858_s4 + $0x310] sm:$0xff] }
 0x1b0   :  { %1064 = vmatmul.mubr.f32.gmra.mxu1 %v3196_v36  ;;  %2031 = vmatprep.subr.mxu1 %v799_v26  ;;  %v796_v36 = vld [vmem:[%s3858_s4 + $0x3a0] sm:$0xff]  ;;  %v793_v26 = vld [vmem:[%s3858_s4 + $0x388] sm:$0xff] }
 0x1b1   :  { %1068 = vmatprep.mubr.f32.mxu1 %v3068_v38  ;;  %2032 = vmatpush3.msra.mxu1 %v783_v48  ;;  %v777_v48 = vld [vmem:[%s3858_s4 + $0x308] sm:$0xff] }
 0x1b2   :  { %2033 = vmatprep.subr.mxu1 %v798_v3  ;;  %v776_v3 = vld [vmem:[%s3858_s4 + $0x300] sm:$0xff] }
 0x1b3   :  { %2034 = vmatpush3.msra.mxu1 %v782_v57 }
 0x1b4   :  { %1069 = vmatmul.mubr.f32.gmra.mxu1 %v3217_v60  ;;  %2035 = vmatprep.subr.mxu1 %v797_v12  ;;  %v794_v60 = vld [vmem:[%s3858_s4 + $0x390] sm:$0xff] }
 0x1b5   :  { %1073 = vmatprep.mubr.f32.mxu1 %v3035_v58  ;;  %2036 = vmatpush3.msra.mxu1 %v781_v35 }
 0x1b6   :  { %2037 = vmatprep.subr.mxu1 %v796_v36 }
 0x1b7   :  { %2038 = vmatpush3.msra.mxu1 %v780_v30 }
 0x1b8   :  { %1074 = vmatmul.mubr.f32.gmra.mxu1 %v3238_v54  ;;  %2039 = vmatprep.subr.mxu1 %v795_v61  ;;  %v792_v54 = vld [vmem:[%s3858_s4 + $0x380] sm:$0xff] }
 0x1b9   :  { %1078 = vmatprep.mubr.f32.mxu1 %v3096_v31  ;;  %2040 = vmatpush3.msra.mxu1 %v779_v44 }
 0x1ba   :  { %2041 = vmatprep.subr.mxu1 %v794_v60 }
 0x1bb   :  { %2042 = vmatpush3.msra.mxu1 %v778_v27 }
 0x1bc   :  { %1079 = vmatmul.mubr.f32.gmra.mxu1 %v3259_v56  ;;  %2043 = vmatprep.subr.mxu1 %v793_v26  ;;  %v3878_v56 = vmov 0.0  }
 0x1bd   :  { %1083 = vmatprep.mubr.f32.mxu1 %v3078_v0  ;;  %2044 = vmatpush3.msra.mxu1 %v777_v48 }
 0x1be   :  { %2045 = vmatprep.subr.mxu1 %v792_v54 }
 0x1bf   :  { %2046 = vmatpush3.msra.mxu1 %v776_v3 }
 0x1c0   :  { %1084 = vmatmul.mubr.f32.gmra.mxu1 %v3280_v6  ;;  %2311 = vmatprep.subr.mxu1 %v2852_v32 }
 0x1c1   :  { %1088 = vmatprep.mubr.f32.mxu1 %v3138_v34 }
 0x1c4   :  { %1089 = vmatmul.mubr.f32.gmra.mxu1 %v3301_v21 }
 0x1c5   :  { %1093 = vmatprep.mubr.f32.mxu1 %v3122_v13 }
 0x1c8   :  { %1094 = vmatmul.mubr.f32.gmra.mxu1 %v3322_v14 }
 0x1c9   :  { %1098 = vmatprep.mubr.f32.mxu1 %v3168_v46 }
 0x1cc   :  { %1099 = vmatmul.mubr.f32.gmra.mxu1 %v3343_v59 }
 0x1cd   :  { %1103 = vmatprep.mubr.f32.mxu1 %v3161_v23 }
 0x1d0   :  { %1104 = vmatmul.mubr.f32.gmra.mxu1 %v3364_v41 }
 0x1d1   :  { %1108 = vmatprep.mubr.f32.mxu1 %v3878_v56 }
 0x1d4   :  { %1109 = vmatmul.mubr.f32.gmra.mxu1 %v3385_v55 }
 0x1d5   :  { %1323 = vmatprep.mubr.f32.mxu1 %v3059_v24 }
 0x1d8   :  { %1324 = vmatmul.mubr.f32.vlgmr.msra.gmra.mxu1 %v2969_v39  ;;  %v678_v39 = vld [vmem:[#allocation2 + $0x89] sm:$0xff] }
 0x1d9   :  { %2327 = vmatpush3.msra.mxu1 %v2852_v32  ;;  %1328 = vmatprep.mubr.f32.mxu1 %v3101_v17  ;;  %v3879_v32 = vld [vmem:[#allocation4_spill] sm:$0xff] }
 0x1da   :  { %2312 = vmatprep.subr.mxu1 %v3066_v10 }
 0x1db   :  { %2328 = vmatpush3.msra.mxu1 %v3066_v10 }
 0x1dc   :  { %1329 = vmatmul.mubr.f32.gmra.mxu1 %v2962_v42  ;;  %2313 = vmatprep.subr.mxu1 %v3108_v2  ;;  %v3880_v42 = vld [vmem:[#allocation5_spill] sm:$0xff] }
 0x1dd   :  { %1333 = vmatprep.mubr.f32.mxu1 %v3142_v43  ;;  %2329 = vmatpush3.msra.mxu1 %v3108_v2  ;;  %v679_v2 = vld [vmem:[#allocation2 + $0x8a] sm:$0xff] }
 0x1de   :  { %2314 = vmatprep.subr.mxu1 %v3149_v53 }
 0x1df   :  { %2330 = vmatpush3.msra.mxu1 %v3149_v53 }
 0x1e0   :  { %1334 = vmatmul.mubr.f32.gmra.mxu1 %v2993_v22  ;;  %2315 = vmatprep.subr.mxu1 %v3178_v19 }
 0x1e1   :  { %1338 = vmatprep.mubr.f32.mxu1 %v3171_v9  ;;  %2331 = vmatpush3.msra.mxu1 %v3178_v19 }
 0x1e2   :  { %2316 = vmatprep.subr.mxu1 %v3201_v4 }
 0x1e3   :  { %2332 = vmatpush3.msra.mxu1 %v3201_v4 }
 0x1e4   :  { %1339 = vmatmul.mubr.f32.gmra.mxu1 %v2988_v47  ;;  %2317 = vmatprep.subr.mxu1 %v3222_v40  ;;  %v3611_v47 = vld [vmem:[#allocation2 + $0x80] sm:$0xff] }
 0x1e5   :  { %1343 = vmatprep.mubr.f32.mxu1 %v3194_v15  ;;  %2333 = vmatpush3.msra.mxu1 %v3222_v40  ;;  %3881 = vst [vmem:[#allocation4_spill] sm:$0xff] %v3611_v47 }
 0x1e6   :  { %2318 = vmatprep.subr.mxu1 %v3243_v62 }
 0x1e7   :  { %2334 = vmatpush3.msra.mxu1 %v3243_v62 }
 0x1e8   :  { %1344 = vmatmul.mubr.f32.gmra.mxu1 %v3022_v5  ;;  %2319 = vmatprep.subr.mxu1 %v3264_v20 }
 0x1e9   :  { %1348 = vmatprep.mubr.f32.mxu1 %v3215_v16  ;;  %2335 = vmatpush3.msra.mxu1 %v3264_v20 }
 0x1ea   :  { %2320 = vmatprep.subr.mxu1 %v3285_v7 }
 0x1eb   :  { %2336 = vmatpush3.msra.mxu1 %v3285_v7 }
 0x1ec   :  { %1349 = vmatmul.mubr.f32.gmra.mxu1 %v3008_v52  ;;  %2321 = vmatprep.subr.mxu1 %v3306_v1 }
 0x1ed   :  { %1353 = vmatprep.mubr.f32.mxu1 %v3236_v11  ;;  %2337 = vmatpush3.msra.mxu1 %v3306_v1 }
 0x1ee   :  { %2322 = vmatprep.subr.mxu1 %v3327_v45 }
 0x1ef   :  { %2338 = vmatpush3.msra.mxu1 %v3327_v45 }
 0x1f0   :  { %1354 = vmatmul.mubr.f32.gmra.mxu1 %v3068_v38  ;;  %2323 = vmatprep.subr.mxu1 %v3348_v25 }
 0x1f1   :  { %1358 = vmatprep.mubr.f32.mxu1 %v3257_v51  ;;  %2339 = vmatpush3.msra.mxu1 %v3348_v25 }
 0x1f2   :  { %2324 = vmatprep.subr.mxu1 %v3369_v18 }
 0x1f3   :  { %2340 = vmatpush3.msra.mxu1 %v3369_v18 }
 0x1f4   :  { %1359 = vmatmul.mubr.f32.gmra.mxu1 %v3035_v58  ;;  %2325 = vmatprep.subr.mxu1 %v3390_v29 }
 0x1f5   :  { %1363 = vmatprep.mubr.f32.mxu1 %v3278_v50  ;;  %2341 = vmatpush3.msra.mxu1 %v3390_v29 }
 0x1f6   :  { %2326 = vmatprep.subr.mxu1 %v3409_v8 }
 0x1f7   :  { %2342 = vmatpush3.msra.mxu1 %v3409_v8 }
 0x1f8   :  { %1364 = vmatmul.mubr.f32.gmra.mxu1 %v3096_v31 }
 0x1f9   :  { %1368 = vmatprep.mubr.f32.mxu1 %v3299_v63 }
 0x1fc   :  { %1369 = vmatmul.mubr.f32.gmra.mxu1 %v3078_v0 }
 0x1fd   :  { %1373 = vmatprep.mubr.f32.mxu1 %v3320_v37 }
 0x200   :  { %1374 = vmatmul.mubr.f32.gmra.mxu1 %v3138_v34 }
 0x201   :  { %1378 = vmatprep.mubr.f32.mxu1 %v3879_v32 }
 0x204   :  { %1379 = vmatmul.mubr.f32.gmra.mxu1 %v3122_v13 }
 0x205   :  { %1383 = vmatprep.mubr.f32.mxu1 %v3880_v42 }
 0x208   :  { %1384 = vmatmul.mubr.f32.gmra.mxu1 %v3168_v46 }
 0x209   :  { %1388 = vmatprep.mubr.f32.mxu1 %v3383_v28 }
 0x20c   :  { %1389 = vmatmul.mubr.f32.gmra.mxu1 %v3161_v23 }
 0x20d   :  { %1393 = vmatprep.mubr.f32.mxu1 %v3413_v33 }
 0x210   :  { %1394 = vmatmul.mubr.f32.gmra.mxu1 %v3611_v47 }
 0x211   :  { %1398 = vmatprep.mubr.f32.mxu1 %v678_v39 }
 0x214   :  { %1399 = vmatmul.mubr.f32.gmra.mxu1 %v3611_v47 }
 0x215   :  { %2299 = vmatprep.mubr.f32.mxu1 %v3280_v6 }
 0x218   :  { %v1807_v22 = vpop.f32.mrf.mxu1  ;;  %2300 = vmatmul.mubr.f32.vlgmr.msra.gmra.mxu1 %v3301_v21 }
 0x219   :  { %2302 = vmatprep.mubr.f32.mxu1 %v3322_v14 }
 0x21a   :  { %v1808_v52 = vpop.f32.mrf.mxu1 }
 0x21b   :  { %v3618_v5 = vadd.f32 %v1808_v52, %v1807_v22 }
 0x21c   :  { %v1810_v58 = vpop.f32.mrf.mxu1  ;;  %2303 = vmatmul.mubr.f32.gmra.mxu1 %v3343_v59 }
 0x21d   :  { %v3621_v24 = vpop.f32.mrf.mxu0  ;;  %2305 = vmatprep.mubr.f32.mxu1 %v3364_v41 }
 0x21e   :  { %v1811_v10 = vpop.f32.mrf.mxu1 }
 0x21f   :  { %v3624_v38 = vadd.f32 %v1811_v10, %v1810_v58  ;;  %v3626_v0 = vpop.f32.mrf.mxu0 }
 0x220   :  { %v1813_v31 = vpop.f32.mrf.mxu1  ;;  %2306 = vmatmul.mubr.f32.gmra.mxu1 %v3385_v55 }
 0x221   :  { %v3629_v17 = vpop.f32.mrf.mxu0  ;;  %2308 = vmatprep.mubr.f32.mxu1 %v3397_v49 }
 0x222   :  { %v1814_v13 = vpop.f32.mrf.mxu1 }
 0x223   :  { %v3632_v34 = vadd.f32 %v1814_v13, %v1813_v31  ;;  %v3634_v43 = vpop.f32.mrf.mxu0 }
 0x224   :  { %v1816_v53 = vpop.f32.mrf.mxu1  ;;  %2309 = vmatmul.mubr.f32.gmra.mxu1 %v679_v2 }
 0x225   :  { %v3636_v23 = vpop.f32.mrf.mxu0 }
 0x226   :  { %v1817_v46 = vpop.f32.mrf.mxu1 }
 0x227   :  { %v3638_v9 = vadd.f32 %v1817_v46, %v1816_v53  ;;  %v3640_v19 = vpop.f32.mrf.mxu0 }
 0x228   :  { %v1819_v15 = vpop.f32.mrf.mxu1 }
 0x229   :  { %v3642_v4 = vpop.f32.mrf.mxu0 }
 0x22a   :  { %v1820_v16 = vpop.f32.mrf.mxu1 }
 0x22b   :  { %v3644_v40 = vadd.f32 %v1820_v16, %v1819_v15  ;;  %v3646_v11 = vpop.f32.mrf.mxu0 }
 0x22c   :  { %v1822_v62 = vpop.f32.mrf.mxu1 }
 0x22d   :  { %v3648_v51 = vpop.f32.mrf.mxu0 }
 0x22e   :  { %v1823_v20 = vpop.f32.mrf.mxu1 }
 0x22f   :  { %v3650_v50 = vadd.f32 %v1823_v20, %v1822_v62  ;;  %v3652_v6 = vpop.f32.mrf.mxu0 }
 0x230   :  { %v1825_v7 = vpop.f32.mrf.mxu1 }
 0x231   :  { %v3654_v63 = vpop.f32.mrf.mxu0 }
 0x232   :  { %v1826_v21 = vpop.f32.mrf.mxu1 }
 0x233   :  { %v3656_v1 = vadd.f32 %v1826_v21, %v1825_v7  ;;  %v3658_v37 = vpop.f32.mrf.mxu0 }
 0x234   :  { %v1828_v14 = vpop.f32.mrf.mxu1 }
 0x235   :  { %3882 = vst [vmem:[#allocation5_spill] sm:$0xff] %v3656_v1  ;;  %v3660_v45 = vpop.f32.mrf.mxu0 }
 0x236   :  { %3883 = vst [vmem:[#allocation6_spill] sm:$0xff] %v3660_v45  ;;  %v1829_v59 = vpop.f32.mrf.mxu1 }
 0x237   :  { %v3662_v25 = vadd.f32 %v1829_v59, %v1828_v14  ;;  %v3664_v41 = vpop.f32.mrf.mxu0 }
 0x238   :  { %3885 = vst [vmem:[#allocation8_spill] sm:$0xff] %v3664_v41  ;;  %v1831_v18 = vpop.f32.mrf.mxu1 }
 0x239   :  { %3884 = vst [vmem:[#allocation7_spill] sm:$0xff] %v3662_v25  ;;  %v3666_v28 = vpop.f32.mrf.mxu0 }
 0x23a   :  { %3886 = vst [vmem:[#allocation9_spill] sm:$0xff] %v3666_v28  ;;  %v1832_v55 = vpop.f32.mrf.mxu1 }
 0x23b   :  { %v3668_v29 = vadd.f32 %v1832_v55, %v1831_v18  ;;  %v3670_v49 = vpop.f32.mrf.mxu0 }
 0x23c   :  { %3887 = vst [vmem:[#allocation10_spill] sm:$0xff] %v3670_v49  ;;  %v1834_v8 = vpop.f32.mrf.mxu1 }
 0x23d   :  { %v1991_v33 = vpop.f32.mrf.mxu0 }
 0x23e   :  { %v1835_v57 = vpop.f32.mrf.mxu1 }
 0x23f   :  { %v3672_v12 = vadd.f32 %v1835_v57, %v1834_v8  ;;  %v1992_v35 = vpop.f32.mrf.mxu0 }
 0x240   :  { %v3674_v36 = vadd.f32 %v1992_v35, %v1991_v33  ;;  %v1837_v30 = vpop.f32.mrf.mxu1 }
 0x241   :  { %v1994_v61 = vpop.f32.mrf.mxu0 }
 0x242   :  { %v1838_v44 = vpop.f32.mrf.mxu1 }
 0x243   :  { %v3676_v60 = vadd.f32 %v1838_v44, %v1837_v30  ;;  %v1995_v27 = vpop.f32.mrf.mxu0 }
 0x244   :  { %v1996_v26 = vadd.f32 %v1995_v27, %v1994_v61  ;;  %v1840_v48 = vpop.f32.mrf.mxu1 }
 0x245   :  { %v1997_v54 = vpop.f32.mrf.mxu0 }
 0x246   :  { %v1841_v3 = vpop.f32.mrf.mxu1 }
 0x247   :  { %v3678_v56 = vadd.f32 %v1841_v3, %v1840_v48  ;;  %v1998_v32 = vpop.f32.mrf.mxu0 }
 0x248   :  { %v1999_v42 = vadd.f32 %v1998_v32, %v1997_v54  ;;  %v1843_v39 = vpop.f32.mrf.mxu1 }
 0x249   :  { %v2000_v22 = vpop.f32.mrf.mxu0 }
 0x24a   :  { %v1844_v52 = vpop.f32.mrf.mxu1 }
 0x24b   :  { %v3680_v58 = vadd.f32 %v1844_v52, %v1843_v39  ;;  %v2001_v10 = vpop.f32.mrf.mxu0 }
 0x24c   :  { %v2002_v31 = vadd.f32 %v2001_v10, %v2000_v22  ;;  %v1846_v2 = vpop.f32.mrf.mxu1 }
 0x24d   :  { %v2003_v13 = vpop.f32.mrf.mxu0 }
 0x24e   :  { %v1847_v53 = vpop.f32.mrf.mxu1 }
 0x24f   :  { %v3682_v46 = vadd.f32 %v1847_v53, %v1846_v2  ;;  %v2004_v15 = vpop.f32.mrf.mxu0 }
 0x250   :  { %v2005_v16 = vadd.f32 %v2004_v15, %v2003_v13  ;;  %v1849_v62 = vpop.f32.mrf.mxu1 }
 0x251   :  { %v2006_v20 = vpop.f32.mrf.mxu0 }
 0x252   :  { %v1850_v7 = vpop.f32.mrf.mxu1 }
 0x253   :  { %v3684_v21 = vadd.f32 %v1850_v7, %v1849_v62  ;;  %v2007_v14 = vpop.f32.mrf.mxu0 }
 0x254   :  { %v2008_v59 = vadd.f32 %v2007_v14, %v2006_v20  ;;  %v1852_v18 = vpop.f32.mrf.mxu1 }
 0x255   :  { %v2009_v55 = vpop.f32.mrf.mxu0 }
 0x256   :  { %v1853_v8 = vpop.f32.mrf.mxu1 }
 0x257   :  { %v3686_v33 = vadd.f32 %v1853_v8, %v1852_v18  ;;  %v2010_v57 = vpop.f32.mrf.mxu0 }
 0x258   :  { %v2011_v35 = vadd.f32 %v2010_v57, %v2009_v55  ;;  %v1887_v30 = vpop.f32.mrf.mxu1 }
 0x259   :  { %v2012_v61 = vpop.f32.mrf.mxu0 }
 0x25a   :  { %v1888_v44 = vpop.f32.mrf.mxu1 }
 0x25b   :  { %v2013_v27 = vpop.f32.mrf.mxu0 }
 0x25c   :  { %v3688_v48 = vadd.f32 %v2013_v27, %v2012_v61  ;;  %v1890_v54 = vpop.f32.mrf.mxu1 }
 0x25e   :  { %v1891_v3 = vpop.f32.mrf.mxu1 }
 0x260   :  { %v1893_v32 = vpop.f32.mrf.mxu1 }
 0x262   :  { %v1894_v39 = vpop.f32.mrf.mxu1 }
 0x264   :  { %v3690_v22 = vpop.f32.mrf.mxu1 }
 0x266   :  { %v3692_v52 = vpop.f32.mrf.mxu1 }
 0x268   :  { %v3694_v10 = vpop.f32.mrf.mxu1 }
 0x26a   :  { %v3696_v2 = vpop.f32.mrf.mxu1 }
 0x26c   :  { %v3698_v13 = vpop.f32.mrf.mxu1 }
 0x26e   :  { %v3700_v53 = vpop.f32.mrf.mxu1 }
 0x270   :  { %v3702_v15 = vpop.f32.mrf.mxu1 }
 0x272   :  { %v3704_v62 = vpop.f32.mrf.mxu1 }
 0x274   :  { %v3706_v20 = vpop.f32.mrf.mxu1 }
 0x275   :  { %3888 = vst [vmem:[#allocation11_spill] sm:$0xff] %v3706_v20 }
 0x276   :  { %v3708_v7 = vpop.f32.mrf.mxu1 }
 0x277   :  { %3889 = vst [vmem:[#allocation12_spill] sm:$0xff] %v3708_v7 }
 0x278   :  { %v1911_v14 = vpop.f32.mrf.mxu1 }
 0x27a   :  { %v1912_v18 = vpop.f32.mrf.mxu1 }
 0x27b   :  { %v1913_v55 = vadd.f32 %v1912_v18, %v1911_v14 }
 0x27c   :  { %v1914_v8 = vpop.f32.mrf.mxu1 }
 0x27d   :  { %v1076_v57 = vadd.f32 %v1913_v55, %v3668_v29 }
 0x27e   :  { %v1915_v61 = vpop.f32.mrf.mxu1 }
 0x27f   :  { %v1916_v27 = vadd.f32 %v1915_v61, %v1914_v8  ;;  %v3712_v47 = vadd.f32 %v3674_v36, %v1076_v57 }
 0x280   :  { %v1917_v49 = vpop.f32.mrf.mxu1 }
 0x281   :  { %v1081_v28 = vadd.f32 %v1916_v27, %v3672_v12 }
 0x282   :  { %v1918_v25 = vpop.f32.mrf.mxu1 }
 0x283   :  { %v1919_v41 = vadd.f32 %v1918_v25, %v1917_v49  ;;  %v3715_v45 = vadd.f32 %v1996_v26, %v1081_v28 }
 0x284   :  { %v1920_v1 = vpop.f32.mrf.mxu1 }
 0x285   :  { %v1086_v7 = vadd.f32 %v1919_v41, %v3676_v60  ;;  %v1889_v60 = vadd.f32 %v1888_v44, %v1887_v30  ;;  %v2289_v30 = vpop.f32.mrf.mxu0 }
 0x286   :  { %v1921_v20 = vpop.f32.mrf.mxu1 }
 0x287   :  { %v1922_v14 = vadd.f32 %v1921_v20, %v1920_v1  ;;  %v3718_v18 = vadd.f32 %v1999_v42, %v1086_v7 }
 0x288   :  { %v1923_v29 = vpop.f32.mrf.mxu1 }
 0x289   :  { %v1091_v55 = vadd.f32 %v1922_v14, %v3678_v56  ;;  %v1036_v14 = vadd.f32 %v1889_v60, %v3618_v5  ;;  %v1972_v5 = vadd.f32 %v3634_v43, %v3629_v17  ;;  %v1901_v17 = vadd.f32 %v3696_v2, %v3694_v10 }
 0x28a   :  { %v1924_v8 = vpop.f32.mrf.mxu1 }
 0x28b   :  { %v1925_v36 = vadd.f32 %v1924_v8, %v1923_v29  ;;  %v3721_v57 = vadd.f32 %v2002_v31, %v1091_v55  ;;  %v1892_v31 = vadd.f32 %v1891_v3, %v1890_v54  ;;  %v1969_v55 = vadd.f32 %v3626_v0, %v3621_v24 }
 0x28c   :  { %v1926_v61 = vpop.f32.mrf.mxu1  ;;  %v1895_v8 = vadd.f32 %v1894_v39, %v1893_v32 }
 0x28d   :  { %v1096_v12 = vadd.f32 %v1925_v36, %v3680_v58  ;;  %v1181_v36 = vadd.f32 %v1969_v55, %v1036_v14 }
 0x28e   :  { %v1927_v25 = vpop.f32.mrf.mxu1  ;;  %v1046_v0 = vadd.f32 %v1895_v8, %v3632_v34 }
 0x28f   :  { %v1928_v28 = vadd.f32 %v1927_v25, %v1926_v61  ;;  %v3724_v49 = vadd.f32 %v2005_v16, %v1096_v12  ;;  %v1470_v61 = vpop.f32.mrf.mxu0 }
 0x290   :  { %v1929_v26 = vpop.f32.mrf.mxu1 }
 0x291   :  { %v1101_v41 = vadd.f32 %v1928_v28, %v3682_v46  ;;  %v2292_v28 = vpop.f32.mrf.mxu0 }
 0x292   :  { %v1930_v1 = vpop.f32.mrf.mxu1 }
 0x293   :  { %v1931_v42 = vadd.f32 %v1930_v1, %v1929_v26  ;;  %v3727_v20 = vadd.f32 %v2008_v59, %v1101_v41  ;;  %v1041_v59 = vadd.f32 %v1892_v31, %v3624_v38  ;;  %v1898_v38 = vadd.f32 %v3692_v52, %v3690_v22 }
 0x294   :  { %v1932_v56 = vpop.f32.mrf.mxu1  ;;  %v1978_v22 = vadd.f32 %v3646_v11, %v3642_v4 }
 0x295   :  { %v1106_v7 = vadd.f32 %v1931_v42, %v3684_v21  ;;  %v1186_v12 = vadd.f32 %v1972_v5, %v1041_v59  ;;  %v1051_v26 = vadd.f32 %v1898_v38, %v3638_v9  ;;  %v1480_v42 = vpop.f32.mrf.mxu0  ;;  %v1981_v9 = vadd.f32 %v3652_v6, %v3648_v51  ;;  %v3890_v6 = vld [vmem:[#allocation11_spill] sm:$0xff] }
 0x296   :  { %v1933_v27 = vpop.f32.mrf.mxu1  ;;  %v3895_v38 = vld [vmem:[#allocation7_spill] sm:$0xff] }
 0x297   :  { %v1934_v58 = vadd.f32 %v1933_v27, %v1932_v56  ;;  %v3731_v29 = vadd.f32 %v2011_v35, %v1106_v7  ;;  %v1904_v56 = vadd.f32 %v3700_v53, %v3698_v13  ;;  %v1196_v2 = vadd.f32 %v1978_v22, %v1051_v26  ;;  %v2295_v14 = vpop.f32.mrf.mxu0  ;;  %v3896_v26 = vld [vmem:[#allocation9_spill] sm:$0xff] }
 0x298   :  { %v2047_v16 = vpop.f32.mrf.mxu1  ;;  %v1984_v53 = vadd.f32 %v3658_v37, %v3654_v63 }
 0x299   :  { %v1111_v46 = vadd.f32 %v1934_v58, %v3686_v33  ;;  %v1061_v58 = vadd.f32 %v1904_v56, %v3650_v50  ;;  %v1490_v51 = vpop.f32.mrf.mxu0 }
 0x29a   :  { %v2048_v44 = vpop.f32.mrf.mxu1 }
 0x29b   :  { %v2049_v21 = vadd.f32 %v2048_v44, %v2047_v16  ;;  %v3738_v54 = vadd.f32 %v3688_v48, %v1111_v46  ;;  %v1975_v48 = vadd.f32 %v3640_v19, %v3636_v23  ;;  %v1056_v23 = vadd.f32 %v1901_v17, %v3644_v40 }
 0x29c   :  { %v2050_v35 = vpop.f32.mrf.mxu1  ;;  %v1907_v40 = vadd.f32 %v3704_v62, %v3702_v15  ;;  %v1206_v5 = vadd.f32 %v1984_v53, %v1061_v58 }
 0x29d   :  { %v1326_v3 = vadd.f32 %v2049_v21, %v1181_v36  ;;  %v1191_v34 = vadd.f32 %v1975_v48, %v1046_v0  ;;  %v1201_v4 = vadd.f32 %v1981_v9, %v1056_v23  ;;  %v3892_v36 = vld [vmem:[#allocation5_spill] sm:$0xff]  ;;  %v2298_v0 = vpop.f32.mrf.mxu0 }
 0x29e   :  { %v2051_v24 = vpop.f32.mrf.mxu1  ;;  %v1066_v21 = vadd.f32 %v1907_v40, %v3892_v36 }
 0x29f   :  { %v1471_v33 = vadd.f32 %v1470_v61, %v1326_v3  ;;  %v2052_v32 = vadd.f32 %v2051_v24, %v2050_v35  ;;  %v3893_v3 = vld [vmem:[#allocation6_spill] sm:$0xff]  ;;  %v3894_v61 = vld [vmem:[#allocation8_spill] sm:$0xff] }
 0x2a0   :  { %v2053_v39 = vpop.f32.mrf.mxu1 }
 0x2a1   :  { %1549 = vst [vmem:[#allocation3] sm:$0xff] %v1471_v33  ;;  %v1331_v25 = vadd.f32 %v2052_v32, %v1186_v12  ;;  %v1987_v12 = vadd.f32 %v3894_v61, %v3893_v3 }
 0x2a2   :  { %v2054_v43 = vpop.f32.mrf.mxu1 }
 0x2a3   :  { %v1476_v41 = vadd.f32 %v2289_v30, %v1331_v25  ;;  %v2055_v1 = vadd.f32 %v2054_v43, %v2053_v39  ;;  %v3891_v30 = vld [vmem:[#allocation12_spill] sm:$0xff]  ;;  %v3771_v39 = vld [vmem:[%s3861_s5] ss:$0 sm:$0xff]  ;;  %v1211_v17 = vadd.f32 %v1987_v12, %v1066_v21 }
 0x2a4   :  { %v2056_v60 = vpop.f32.mrf.mxu1  ;;  %v1910_v59 = vadd.f32 %v3891_v30, %v3890_v6 }
 0x2a5   :  { %1550 = vst [vmem:[#allocation3 + $0x8] sm:$0xff] %v1476_v41  ;;  %v1336_v52 = vadd.f32 %v2055_v1, %v1191_v34  ;;  %v3897_v34 = vld [vmem:[#allocation10_spill] sm:$0xff] }
 0x2a6   :  { %v2057_v19 = vpop.f32.mrf.mxu1  ;;  %v1071_v32 = vadd.f32 %v1910_v59, %v3895_v38  ;;  %v1990_v1 = vadd.f32 %v3897_v34, %v3896_v26 }
 0x2a7   :  { %v1481_v10 = vadd.f32 %v1480_v42, %v1336_v52  ;;  %v2058_v7 = vadd.f32 %v2057_v19, %v2056_v60  ;;  %v1500_v42 = vpop.f32.mrf.mxu0 }
 0x2a8   :  { %v2059_v31 = vpop.f32.mrf.mxu1  ;;  %v1216_v23 = vadd.f32 %v1990_v1, %v1071_v32 }
 0x2a9   :  { %1551 = vst [vmem:[#allocation3 + $0x10] sm:$0xff] %v1481_v10  ;;  %v1341_v27 = vadd.f32 %v2058_v7, %v1196_v2 }
 0x2aa   :  { %v2060_v11 = vpop.f32.mrf.mxu1 }
 0x2ab   :  { %v1486_v16 = vadd.f32 %v2292_v28, %v1341_v27  ;;  %v2061_v55 = vadd.f32 %v2060_v11, %v2059_v31 }
 0x2ac   :  { %v2062_v13 = vpop.f32.mrf.mxu1  ;;  %v1583_v44 = vld [vmem:[#allocation3 + $0x1] sm:$0xff] }
 0x2ad   :  { %1552 = vst [vmem:[#allocation3 + $0x18] sm:$0xff] %v1486_v16  ;;  %v1346_v46 = vadd.f32 %v2061_v55, %v1201_v4  ;;  %v1599_v24 = vmax.f32 %v1471_v33, %v1583_v44 }
 0x2ae   :  { %v2063_v8 = vpop.f32.mrf.mxu1 }
 0x2af   :  { %v1491_v50 = vadd.f32 %v1490_v51, %v1346_v46  ;;  %v2064_v35 = vadd.f32 %v2063_v8, %v2062_v13 }
 0x2b0   :  { %v1584_v15 = vld [vmem:[#allocation3 + $0x9] sm:$0xff]  ;;  %v2065_v62 = vpop.f32.mrf.mxu1 }
 0x2b1   :  { %v1600_v63 = vmax.f32 %v1476_v41, %v1584_v15  ;;  %1553 = vst [vmem:[#allocation3 + $0x20] sm:$0xff] %v1491_v50  ;;  %v1351_v37 = vadd.f32 %v2064_v35, %v1206_v5 }
 0x2b2   :  { %v2066_v48 = vpop.f32.mrf.mxu1 }
 0x2b3   :  { %v1618_v25 = vmax.f32 %v1599_v24, %v1600_v63  ;;  %v1496_v28 = vadd.f32 %v2295_v14, %v1351_v37  ;;  %v2067_v43 = vadd.f32 %v2066_v48, %v2065_v62 }
 0x2b4   :  { %v1585_v33 = vld [vmem:[#allocation3 + $0x11] sm:$0xff]  ;;  %v2068_v41 = vpop.f32.mrf.mxu1 }
 0x2b5   :  { %v1641_v60 = vadd.f32 %v3771_v39, %v1618_v25  ;;  %v1601_v22 = vmax.f32 %v1481_v10, %v1585_v33  ;;  %1554 = vst [vmem:[#allocation3 + $0x28] sm:$0xff] %v1496_v28  ;;  %v1356_v52 = vadd.f32 %v2067_v43, %v1211_v17 }
 0x2b6   :  { %v2069_v19 = vpop.f32.mrf.mxu1 }
 0x2b7   :  { %v1657_v56 = vmax.f32 %v1641_v60, 0.0  ;;  %v1619_v2 = vmax.f32 %v1600_v63, %v1601_v22  ;;  %v1501_v7 = vadd.f32 %v1500_v42, %v1356_v52  ;;  %v2070_v9 = vadd.f32 %v2069_v19, %v2068_v41 }
 0x2b8   :  { %v1586_v31 = vld [vmem:[#allocation3 + $0x19] sm:$0xff]  ;;  %v2071_v27 = vpop.f32.mrf.mxu1 }
 0x2b9   :  { %1673 = vst [vmem:[%s3862_s6] sm:$0xff] %v1657_v56  ;;  %v1642_v14 = vadd.f32 %v3771_v39, %v1619_v2  ;;  %v1602_v4 = vmax.f32 %v1486_v16, %v1586_v31  ;;  %1555 = vst [vmem:[#allocation3 + $0x30] sm:$0xff] %v1501_v7  ;;  %v1361_v10 = vadd.f32 %v2070_v9, %v1216_v23 }
 0x2ba   :  { %v2072_v11 = vpop.f32.mrf.mxu1 }
 0x2bb   :  { %v1658_v58 = vmax.f32 %v1642_v14, 0.0  ;;  %v1620_v40 = vmax.f32 %v1601_v22, %v1602_v4  ;;  %v3780_v55 = vadd.f32 %v2298_v0, %v1361_v10  ;;  %v2073_v26 = vadd.f32 %v2072_v11, %v2071_v27 }
 0x2bc   :  { %v1587_v13 = vld [vmem:[#allocation3 + $0x21] sm:$0xff]  ;;  %v2074_v53 = vpop.f32.mrf.mxu1 }
 0x2bd   :  { %1674 = vst [vmem:[%s3862_s6 + $0x8] sm:$0xff] %v1658_v58  ;;  %v1643_v46 = vadd.f32 %v3771_v39, %v1620_v40  ;;  %v1603_v51 = vmax.f32 %v1491_v50, %v1587_v13  ;;  %1556 = vst [vmem:[#allocation3 + $0x38] sm:$0xff] %v3780_v55  ;;  %v1366_v52 = vadd.f32 %v2073_v26, %v3712_v47 }
 0x2be   :  { %v2075_v6 = vpop.f32.mrf.mxu1 }
 0x2bf   :  { %v1659_v16 = vmax.f32 %v1643_v46, 0.0  ;;  %v1621_v30 = vmax.f32 %v1602_v4, %v1603_v51  ;;  %v2076_v17 = vadd.f32 %v2075_v6, %v2074_v53 }
 0x2c0   :  { %v1588_v59 = vld [vmem:[#allocation3 + $0x29] sm:$0xff]  ;;  %v2077_v44 = vpop.f32.mrf.mxu1 }
 0x2c1   :  { %1675 = vst [vmem:[%s3862_s6 + $0x10] sm:$0xff] %v1659_v16  ;;  %v1644_v8 = vadd.f32 %v3771_v39, %v1621_v30  ;;  %v1604_v36 = vmax.f32 %v1496_v28, %v1588_v59  ;;  %v1371_v33 = vadd.f32 %v2076_v17, %v3715_v45 }
 0x2c2   :  { %v2078_v21 = vpop.f32.mrf.mxu1 }
 0x2c3   :  { %v1660_v5 = vmax.f32 %v1644_v8, 0.0  ;;  %v1622_v35 = vmax.f32 %v1603_v51, %v1604_v36  ;;  %v2079_v60 = vadd.f32 %v2078_v21, %v2077_v44 }
 0x2c4   :  { %v1589_v15 = vld [vmem:[#allocation3 + $0x31] sm:$0xff]  ;;  %v2080_v62 = vpop.f32.mrf.mxu1 }
 0x2c5   :  { %1676 = vst [vmem:[%s3862_s6 + $0x18] sm:$0xff] %v1660_v5  ;;  %v1645_v50 = vadd.f32 %v3771_v39, %v1622_v35  ;;  %v3795_v3 = vmax.f32 %v1501_v7, %v1589_v15  ;;  %v1376_v31 = vadd.f32 %v2079_v60, %v3718_v18 }
 0x2c6   :  { %v2081_v61 = vpop.f32.mrf.mxu1 }
 0x2c7   :  { %v1661_v12 = vmax.f32 %v1645_v50, 0.0  ;;  %v1623_v24 = vmax.f32 %v1604_v36, %v3795_v3  ;;  %v2082_v1 = vadd.f32 %v2081_v61, %v2080_v62 }
 0x2c8   :  { %v2083_v63 = vpop.f32.mrf.mxu1 }
 0x2c9   :  { %1677 = vst [vmem:[%s3862_s6 + $0x20] sm:$0xff] %v1661_v12  ;;  %v1646_v37 = vadd.f32 %v3771_v39, %v1623_v24  ;;  %v1381_v56 = vadd.f32 %v2082_v1, %v3721_v57 }
 0x2ca   :  { %v2084_v0 = vpop.f32.mrf.mxu1 }
 0x2cb   :  { %v1662_v38 = vmax.f32 %v1646_v37, 0.0  ;;  %v2085_v7 = vadd.f32 %v2084_v0, %v2083_v63 }
 0x2cc   :  { %v2086_v32 = vpop.f32.mrf.mxu1 }
 0x2cd   :  { %1678 = vst [vmem:[%s3862_s6 + $0x28] sm:$0xff] %v1662_v38  ;;  %v1386_v58 = vadd.f32 %v2085_v7, %v3724_v49  ;;  %v3898_v38 = vld [vmem:[#allocation4_spill] sm:$0xff] }
 0x2ce   :  { %v2087_v48 = vpop.f32.mrf.mxu1 }
 0x2cf   :  { %v2088_v23 = vadd.f32 %v2087_v48, %v2086_v32 }
 0x2d0   :  { %v2089_v25 = vpop.f32.mrf.mxu1 }
 0x2d1   :  { %v1391_v4 = vadd.f32 %v2088_v23, %v3727_v20 }
 0x2d2   :  { %v2090_v28 = vpop.f32.mrf.mxu1 }
 0x2d3   :  { %v2091_v47 = vadd.f32 %v2090_v28, %v2089_v25 }
 0x2d4   :  { %v2092_v43 = vpop.f32.mrf.mxu1 }
 0x2d5   :  { %v1396_v20 = vadd.f32 %v2091_v47, %v3731_v29  ;;  %v1616_v29 = vld [vmem:[#allocation3 + $0x81] sm:$0xff] }
 0x2d6   :  { %v2093_v34 = vpop.f32.mrf.mxu1  ;;  %v1617_v32 = vmax.f32 %v3898_v38, %v1616_v29 }
 0x2d7   :  { %v2094_v14 = vadd.f32 %v2093_v34, %v2092_v43 }
 0x2d8   :  { %v2301_v41 = vpop.f32.mrf.mxu1 }
 0x2d9   :  { %v1516_v22 = vadd.f32 %v2301_v41, %v1371_v33  ;;  %v1401_v13 = vadd.f32 %v2094_v14, %v3738_v54 }
 0x2da   :  { %v1510_v42 = vpop.f32.mrf.mxu1 }
 0x2db   :  { %1558 = vst [vmem:[#allocation3 + $0x48] sm:$0xff] %v1516_v22  ;;  %v1511_v19 = vadd.f32 %v1510_v42, %v1366_v52 }
 0x2dc   :  { %v2304_v2 = vpop.f32.mrf.mxu1 }
 0x2dd   :  { %1557 = vst [vmem:[#allocation3 + $0x40] sm:$0xff] %v1511_v19  ;;  %v1526_v9 = vadd.f32 %v2304_v2, %v1381_v56 }
 0x2de   :  { %v1520_v27 = vpop.f32.mrf.mxu1 }
 0x2df   :  { %1560 = vst [vmem:[#allocation3 + $0x58] sm:$0xff] %v1526_v9  ;;  %v1521_v45 = vadd.f32 %v1520_v27, %v1376_v31 }
 0x2e0   :  { %v2307_v10 = vpop.f32.mrf.mxu1 }
 0x2e1   :  { %1559 = vst [vmem:[#allocation3 + $0x50] sm:$0xff] %v1521_v45  ;;  %v1536_v11 = vadd.f32 %v2307_v10, %v1391_v4 }
 0x2e2   :  { %v1530_v40 = vpop.f32.mrf.mxu1 }
 0x2e3   :  { %1562 = vst [vmem:[#allocation3 + $0x68] sm:$0xff] %v1536_v11  ;;  %v1531_v57 = vadd.f32 %v1530_v40, %v1386_v58 }
 0x2e4   :  { %v1590_v53 = vld [vmem:[#allocation3 + $0x39] sm:$0xff]  ;;  %v1591_v46 = vld [vmem:[#allocation3 + $0x41] sm:$0xff]  ;;  %v2310_v18 = vpop.f32.mrf.mxu1 }
 0x2e5   :  { %v1606_v51 = vmax.f32 %v3780_v55, %v1590_v53  ;;  %v1607_v6 = vmax.f32 %v1511_v19, %v1591_v46  ;;  %1561 = vst [vmem:[#allocation3 + $0x60] sm:$0xff] %v1531_v57  ;;  %v1546_v16 = vadd.f32 %v2310_v18, %v1401_v13 }
 0x2e6   :  { %v1540_v30 = vpop.f32.mrf.mxu1 }
 0x2e7   :  { %v1624_v59 = vmax.f32 %v3795_v3, %v1606_v51  ;;  %v1625_v44 = vmax.f32 %v1606_v51, %v1607_v6  ;;  %1564 = vst [vmem:[#allocation3 + $0x78] sm:$0xff] %v1546_v16  ;;  %v1541_v49 = vadd.f32 %v1540_v30, %v1396_v20 }
 0x2e8   :  { %v1592_v8 = vld [vmem:[#allocation3 + $0x49] sm:$0xff]  ;;  %v1593_v36 = vld [vmem:[#allocation3 + $0x51] sm:$0xff] }
 0x2e9   :  { %v1647_v54 = vadd.f32 %v3771_v39, %v1624_v59  ;;  %v1648_v21 = vadd.f32 %v3771_v39, %v1625_v44  ;;  %v1608_v5 = vmax.f32 %v1516_v22, %v1592_v8  ;;  %v1609_v35 = vmax.f32 %v1521_v45, %v1593_v36  ;;  %1563 = vst [vmem:[#allocation3 + $0x70] sm:$0xff] %v1541_v49 }
 0x2eb   :  { %v1663_v55 = vmax.f32 %v1647_v54, 0.0  ;;  %v1664_v15 = vmax.f32 %v1648_v21, 0.0  ;;  %v1626_v62 = vmax.f32 %v1607_v6, %v1608_v5  ;;  %v1627_v50 = vmax.f32 %v1608_v5, %v1609_v35 }
 0x2ec   :  { %v1594_v61 = vld [vmem:[#allocation3 + $0x59] sm:$0xff]  ;;  %v1595_v12 = vld [vmem:[#allocation3 + $0x61] sm:$0xff] }
 0x2ed   :  { %1679 = vst [vmem:[%s3862_s6 + $0x30] sm:$0xff] %v1663_v55  ;;  %1680 = vst [vmem:[%s3862_s6 + $0x38] sm:$0xff] %v1664_v15  ;;  %v1649_v3 = vadd.f32 %v3771_v39, %v1626_v62  ;;  %v1650_v24 = vadd.f32 %v3771_v39, %v1627_v50  ;;  %v1610_v63 = vmax.f32 %v1526_v9, %v1594_v61 }
 0x2ee   :  { %v1611_v37 = vmax.f32 %v1531_v57, %v1595_v12  ;;  %v1598_v0 = vld [vmem:[#allocation3 + $0x79] sm:$0xff] }
 0x2ef   :  { %v1665_v48 = vmax.f32 %v1649_v3, 0.0  ;;  %v1666_v25 = vmax.f32 %v1650_v24, 0.0  ;;  %v1628_v28 = vmax.f32 %v1609_v35, %v1610_v63  ;;  %v1614_v43 = vmax.f32 %v1546_v16, %v1598_v0 }
 0x2f0   :  { %v1629_v17 = vmax.f32 %v1610_v63, %v1611_v37  ;;  %v1596_v26 = vld [vmem:[#allocation3 + $0x69] sm:$0xff]  ;;  %v1597_v34 = vld [vmem:[#allocation3 + $0x71] sm:$0xff] }
 0x2f1   :  { %1681 = vst [vmem:[%s3862_s6 + $0x40] sm:$0xff] %v1665_v48  ;;  %1682 = vst [vmem:[%s3862_s6 + $0x48] sm:$0xff] %v1666_v25  ;;  %v1651_v1 = vadd.f32 %v3771_v39, %v1628_v28  ;;  %v1612_v41 = vmax.f32 %v1536_v11, %v1596_v26  ;;  %v1613_v60 = vmax.f32 %v1541_v49, %v1597_v34 }
 0x2f2   :  { %v1652_v33 = vadd.f32 %v3771_v39, %v1629_v17  ;;  %v1633_v22 = vmax.f32 %v1614_v43, %v1617_v32 }
 0x2f3   :  { %v1667_v52 = vmax.f32 %v1651_v1, 0.0  ;;  %v1630_v23 = vmax.f32 %v1611_v37, %v1612_v41  ;;  %v1631_v19 = vmax.f32 %v1612_v41, %v1613_v60  ;;  %v1632_v2 = vmax.f32 %v1613_v60, %v1614_v43 }
 0x2f4   :  { %v1668_v42 = vmax.f32 %v1652_v33, 0.0  ;;  %v1656_v56 = vadd.f32 %v3771_v39, %v1633_v22 }
 0x2f5   :  { %1683 = vst [vmem:[%s3862_s6 + $0x50] sm:$0xff] %v1667_v52  ;;  %v1653_v7 = vadd.f32 %v3771_v39, %v1630_v23  ;;  %v1654_v9 = vadd.f32 %v3771_v39, %v1631_v19  ;;  %v1655_v27 = vadd.f32 %v3771_v39, %v1632_v2 }
 0x2f6   :  { %1684 = vst [vmem:[%s3862_s6 + $0x58] sm:$0xff] %v1668_v42  ;;  %v1672_v31 = vmax.f32 %v1656_v56, 0.0 }
 0x2f7   :  { %v1669_v14 = vmax.f32 %v1653_v7, 0.0  ;;  %v1670_v45 = vmax.f32 %v1654_v9, 0.0  ;;  %v1671_v4 = vmax.f32 %v1655_v27, 0.0 }
 0x2f8   :  { %1688 = vst [vmem:[%s3862_s6 + $0x78] sm:$0xff] %v1672_v31 }
 0x2f9   :  { %1685 = vst [vmem:[%s3862_s6 + $0x60] sm:$0xff] %v1669_v14  ;;  %1686 = vst [vmem:[%s3862_s6 + $0x68] sm:$0xff] %v1670_v45 }
 0x2fa   :  { %1687 = vst [vmem:[%s3862_s6 + $0x70] sm:$0xff] %v1671_v4 }

</bundles_post_ra>
